<compile_context>
chip_gen: v7x
topology: tpu7x:2x2x1
jax: 0.10.0
libtpu: 0.0.40
codegen_flags: <defaults>
</compile_context>

<pallas_src>
import jax
import jax.numpy as jnp
import numpy as np
from jax.experimental import pallas as pl
from jax.experimental.pallas import tpu as pltpu


def _round_up(a, b):
    return (a + b - 1) // b * b


def _vmem_capacity_bytes():
    """Per-core VMEM capacity; conservative 64 MiB (v7x) fallback if the query fails."""
    try:
        info = pltpu.get_tpu_info()
        for attr in ("vmem_capacity_bytes", "vmem_size_bytes", "vmem_bytes"):
            val = getattr(info, attr, None)
            if val:
                return int(val)
    except Exception:
        pass
    return 64 * 1024 * 1024


def _est_vmem_bytes(tile_n, tile_p, k, x_bytes, w_bytes):
    """Conservative VMEM footprint estimate: lane/sublane padding, double-buffered streamed
    tiles, (assumed) double-buffered weights, accumulator scratch and in-kernel temporaries."""
    lanes_p = _round_up(tile_p, 128)
    lanes_k = _round_up(k + 1, 128)
    sub_x = 16 if x_bytes == 2 else 8
    sub_w = 16 if w_bytes == 2 else 8
    tn_x = _round_up(tile_n, sub_x)
    tn_f32 = _round_up(tile_n, 8)
    tp_w = _round_up(tile_p, sub_w)
    total = 0
    total += 2 * tn_x * lanes_p * x_bytes        # x tile, double-buffered
    total += 2 * tn_f32 * 128 * 4                # out tile (1 col pads to 128 lanes), dbuf
    total += 2 * tp_w * lanes_k * w_bytes        # [w | v] weights (assume double-buffered)
    total += 2 * tp_w * 128 * w_bytes            # rowsum(v^2) (assume double-buffered)
    total += tn_f32 * lanes_k * 4                # acc_xv scratch
    total += tn_f32 * 128 * 4                    # acc_i2 scratch
    total += tn_x * lanes_p * x_bytes            # x*x temporary
    total += 2 * tn_f32 * lanes_k * 4            # xv result / finalize temporaries
    return total


def fm_kernel(b_ref, x_ref, vcat_ref, s_ref, o_ref, acc_xv, acc_i2):
    """One (batch tile, feature tile) grid step.  vcat column 0 is the linear weight."""
    j = pl.program_id(1)                         # feature (reduction) axis — last in the grid

    @pl.when(j == 0)
    def _init():
        acc_xv[...] = jnp.zeros_like(acc_xv)
        acc_i2[...] = jnp.zeros_like(acc_i2)

    x = x_ref[...]                                                          # (TN, TP)
    acc_xv[...] += jnp.dot(x, vcat_ref[...], preferred_element_type=jnp.float32)      # (TN, K+1)
    acc_i2[...] += jnp.dot(x * x, s_ref[...], preferred_element_type=jnp.float32)     # (TN, 1)

    @pl.when(j == pl.num_programs(1) - 1)
    def _finalize():
        xv = acc_xv[...]                          # col 0 = linear part (no bias yet)
        linear = xv[:, :1]
        sum_sq = jnp.sum(xv * xv, axis=1, keepdims=True) - linear * linear  # sum(inter1^2)
        pair = sum_sq - acc_i2[...]
        o_ref[...] = (linear + b_ref[0, 0] + 0.5 * pair).astype(o_ref.dtype)


def fm_forward(x, w, b, v, *, stream_dtype=None, tile_n=None, tile_p=None,
               vmem_budget_bytes=None):
    """FactorizationMachine forward (d=False).

    x: (N, P); w: (P, 1) linear weight (transposed vs nn.Linear); b: bias (any shape with 1
    element); v: (P, K) FM factors.  Returns (N, 1) float32.
    """
    N, P = x.shape
    K = v.shape[1]

    # ---- streamed dtype (bf16 halves x HBM traffic; dots still accumulate in f32) ----------
    x_dt = jnp.dtype(stream_dtype) if stream_dtype is not None else jnp.dtype(x.dtype)
    if x_dt not in (jnp.dtype(jnp.float32), jnp.dtype(jnp.bfloat16)):
        x_dt = jnp.dtype(jnp.float32)
    x_bytes = x_dt.itemsize
    w_dt, w_bytes = x_dt, x_dt.itemsize
    sub = 16 if x_bytes == 2 else 8              # sublane packing for the streamed dtype

    # ---- VMEM budget / limit (per generation: ~45% of reported capacity) -------------------
    cap = _vmem_capacity_bytes()
    if vmem_budget_bytes is None:
        vmem_budget_bytes = int(cap * 0.45)

    # ---- feature (reduction) tiling: only when the resident weights won't fit --------------
    if tile_p is not None and tile_p < P:
        if P % tile_p != 0 or tile_p % 128 != 0:
            raise ValueError("tile_p must be a multiple of 128 that divides P")
    else:
        tile_p = P
        if (_est_vmem_bytes(256, P, K, x_bytes, w_bytes) > vmem_budget_bytes
                and P % 128 == 0):
            for cand in (2048, 1024, 512, 256, 128):
                if (P % cand == 0 and cand < P
                        and _est_vmem_bytes(256, cand, K, x_bytes, w_bytes) <= vmem_budget_bytes):
                    tile_p = cand
                    break
        # TODO(synk): P too large for VMEM *and* not a multiple of 128 would need zero-padded
        # weights to tile the reduction axis safely; left unhandled (tile_n just shrinks).
    p_tiles = P // tile_p

    # ---- batch tiling: biggest tile that fits; single grid step if the whole batch fits ----
    if tile_n is None:
        if _est_vmem_bytes(N, tile_p, K, x_bytes, w_bytes) <= vmem_budget_bytes:
            tile_n = N                            # small-batch fast path: one grid step
        else:
            tile_n = sub
            for cand in (4096, 2048, 1024, 512, 256, 128, 64, 32, 16):
                if (cand % sub == 0 and cand <= N
                        and _est_vmem_bytes(cand, tile_p, K, x_bytes, w_bytes) <= vmem_budget_bytes):
                    tile_n = cand
                    break
    else:
        tile_n = int(tile_n)
        if tile_n >= N:
            tile_n = N
        else:
            tile_n = max(sub, (tile_n // sub) * sub)
    n_tiles = pl.cdiv(N, tile_n)

    est = _est_vmem_bytes(tile_n, tile_p, K, x_bytes, w_bytes)
    vmem_limit = int(min(cap - cap // 8, max(32 * 1024 * 1024, 2 * est)))

    # ---- wrapper-side algebraic fusion ------------------------------------------------------
    #   vcat = [w | v]  : one (TN,TP)@(TP,K+1) matmul yields linear AND inter1 (w in column 0
    #                     so the single-lane slice is lane-aligned).
    #   s    = rowsum(v*v): sum_k((x^2)@(v^2)) == (x^2)@rowsum(v^2) -> width-1 contraction.
    x = x.astype(x_dt)
    w32 = jnp.asarray(w, jnp.float32).reshape(P, 1)
    v32 = jnp.asarray(v, jnp.float32)
    vcat = jnp.concatenate([w32, v32], axis=1).astype(w_dt)                 # (P, K+1)
    s = jnp.sum(v32 * v32, axis=1, keepdims=True).astype(w_dt)              # (P, 1)
    b2 = jnp.asarray(b, jnp.float32).reshape(1, 1)

    def _call(single_buffer_weights):
        # Weights are grid-invariant when p_tiles == 1 -> single-buffer them to free VMEM.
        if single_buffer_weights and p_tiles == 1:
            vcat_spec = pl.BlockSpec((tile_p, K + 1), lambda i, j: (j, 0),
                                     pipeline_mode=pl.Buffered(1))
            s_spec = pl.BlockSpec((tile_p, 1), lambda i, j: (j, 0),
                                  pipeline_mode=pl.Buffered(1))
        else:
            vcat_spec = pl.BlockSpec((tile_p, K + 1), lambda i, j: (j, 0))
            s_spec = pl.BlockSpec((tile_p, 1), lambda i, j: (j, 0))

        return pl.pallas_call(
            fm_kernel,
            out_shape=jax.ShapeDtypeStruct((N, 1), jnp.float32),
            grid_spec=pltpu.PrefetchScalarGridSpec(
                num_scalar_prefetch=0,
                grid=(n_tiles, p_tiles),                                     # reduction axis last
                in_specs=[
                    pl.BlockSpec(memory_space=pltpu.MemorySpace.SMEM),       # bias scalar
                    pl.BlockSpec((tile_n, tile_p), lambda i, j: (i, j)),     # x: streamed
                    vcat_spec,                                               # [w | v]
                    s_spec,                                                  # rowsum(v^2)
                ],
                out_specs=pl.BlockSpec((tile_n, 1), lambda i, j: (i, 0)),
                scratch_shapes=[
                    pltpu.VMEM((tile_n, K + 1), jnp.float32),                # acc_xv
                    pltpu.VMEM((tile_n, 1), jnp.float32),                    # acc_i2
                ],
            ),
            compiler_params=pltpu.CompilerParams(
                dimension_semantics=("parallel", "arbitrary"),               # megacore on batch
                vmem_limit_bytes=vmem_limit,
            ),
        )(b2, x, vcat, s)

    try:
        return _call(True)
    except Exception:
        # pl.Buffered(1) (single-buffered resident weights) not supported on this jax
        # version -> retry with default double-buffering (accounted for in the budget).
        return _call(False)


def fm_reference(x, w, b, v):
    linear_part = x @ w + b[0, 0]                    # (N, 1)
    inter1 = x @ v
    inter2 = (x ** 2) @ (v ** 2)
    pair = jnp.sum(inter1 ** 2 - inter2, axis=1)     # (N,)
    out = linear_part.T + 0.5 * pair                 # (1, N) — the module's odd broadcast
    return out.reshape(-1, 1)                        # (N, 1)


if __name__ == "__main__":
    key = jax.random.PRNGKey(0)
    kx, kw, kb, kv, kx2, kw2, kb2, kv2 = jax.random.split(key, 8)

    # Main config: batch N=300 (not a multiple of the tile -> exercises the ragged tail),
    # p=64 features, k=16 FM factors.
    N, P, K = 300, 64, 16
    x = jax.random.normal(kx, (N, P), dtype=jnp.float32)
    w = jax.random.normal(kw, (P, 1), dtype=jnp.float32) * 0.1   # linear weight (transposed)
    b = jax.random.normal(kb, (1, 1), dtype=jnp.float32) * 0.1   # linear bias
    v = jax.random.normal(kv, (P, K), dtype=jnp.float32) * 0.1   # FM factor matrix
    ref = fm_reference(x, w, b, v)

    # 1) f32, forced multi-tile grid with a ragged last tile (300 = 128 + 128 + 44), no pad.
    out = jax.block_until_ready(fm_forward(x, w, b, v, tile_n=128))
    assert out.shape == (N, 1)
    np.testing.assert_allclose(np.asarray(out), np.asarray(ref), rtol=5e-4, atol=5e-4)

    # 2) f32, auto tiling -> small-batch fast path (single grid step, full-array block).
    out = jax.block_until_ready(fm_forward(x, w, b, v))
    np.testing.assert_allclose(np.asarray(out), np.asarray(ref), rtol=5e-4, atol=5e-4)

    # 3) bf16-streamed x / weights (halved HBM traffic), ragged 112-row tiles, f32 accumulation.
    out = jax.block_until_ready(
        fm_forward(x, w, b, v, stream_dtype=jnp.bfloat16, tile_n=112))
    np.testing.assert_allclose(np.asarray(out), np.asarray(ref), rtol=5e-2, atol=3e-1)

    # 4) f32, feature (reduction) axis tiled: P=256 split into two 128-column tiles accumulated
    #    in VMEM scratch (the large-P*K fallback path).
    N2, P2, K2 = 200, 256, 8
    x2 = jax.random.normal(kx2, (N2, P2), dtype=jnp.float32)
    w2 = jax.random.normal(kw2, (P2, 1), dtype=jnp.float32) * 0.1
    b2 = jax.random.normal(kb2, (1, 1), dtype=jnp.float32) * 0.1
    v2 = jax.random.normal(kv2, (P2, K2), dtype=jnp.float32) * 0.1
    out2 = jax.block_until_ready(fm_forward(x2, w2, b2, v2, tile_p=128))
    np.testing.assert_allclose(np.asarray(out2), np.asarray(fm_reference(x2, w2, b2, v2)),
                               rtol=5e-4, atol=5e-4)

    print("KERNEL_OK")
</pallas_src>

<mosaic_0001>
module attributes {stable_mosaic.version = 11 : i64} {
  func.func @fm_kernel(%arg0: i32, %arg1: i32, %arg2: memref<1x1xf32, #tpu.memory_space<smem>>, %arg3: memref<128x64xf32, #tpu.memory_space<vmem>>, %arg4: memref<64x17xf32, #tpu.memory_space<vmem>>, %arg5: memref<64x1xf32, #tpu.memory_space<vmem>>, %arg6: memref<128x1xf32, #tpu.memory_space<vmem>>, %arg7: memref<128x17xf32, #tpu.memory_space<vmem>>, %arg8: memref<128x1xf32, #tpu.memory_space<vmem>>) attributes {dimension_semantics = [#tpu.dimension_semantics<parallel>, #tpu.dimension_semantics<arbitrary>], iteration_bounds = array<i64: 3, 1>, scalar_prefetch = 0 : i64, scratch_operands = 2 : i64, tpu.core_type = #tpu.core_type<tc>, window_params = [{transform_indices = @transform_0, window_bounds = array<i64: 1, 1>}, {transform_indices = @transform_1, window_bounds = array<i64: 128, 64>}, {pipeline_mode = #tpu.pipeline_mode<synchronous>, transform_indices = @transform_2, window_bounds = array<i64: 64, 17>}, {pipeline_mode = #tpu.pipeline_mode<synchronous>, transform_indices = @transform_3, window_bounds = array<i64: 64, 1>}, {transform_indices = @transform_4, window_bounds = array<i64: 128, 1>}]} {
    %c0_i32 = arith.constant 0 : i32
    %0 = arith.cmpi eq, %arg1, %c0_i32 : i32
    %1 = arith.extui %0 : i1 to i32
    %c0_i32_0 = arith.constant 0 : i32
    %2 = arith.cmpi ne, %1, %c0_i32_0 : i32
    scf.if %2 {
      %cst_17 = arith.constant 0.000000e+00 : f32
      %18 = vector.broadcast %cst_17 : f32 to vector<128x17xf32>
      %c0_18 = arith.constant 0 : index
      %c0_19 = arith.constant 0 : index
      %19 = vector.load %arg7[%c0_18, %c0_19] : memref<128x17xf32, #tpu.memory_space<vmem>>, vector<128x17xf32>
      tpu.vector_store %arg7[%c0_18, %c0_19], %18 {strides = array<i32>} : memref<128x17xf32, #tpu.memory_space<vmem>>, vector<128x17xf32>,
      %cst_20 = arith.constant 0.000000e+00 : f32
      %20 = vector.broadcast %cst_20 : f32 to vector<128x1xf32>
      %c0_21 = arith.constant 0 : index
      %c0_22 = arith.constant 0 : index
      %21 = vector.load %arg8[%c0_21, %c0_22] : memref<128x1xf32, #tpu.memory_space<vmem>>, vector<128x1xf32>
      tpu.vector_store %arg8[%c0_21, %c0_22], %20 {strides = array<i32>} : memref<128x1xf32, #tpu.memory_space<vmem>>, vector<128x1xf32>,
    } else {
    }
    %c0 = arith.constant 0 : index
    %c0_1 = arith.constant 0 : index
    %3 = vector.load %arg3[%c0, %c0_1] : memref<128x64xf32, #tpu.memory_space<vmem>>, vector<128x64xf32>
    %c0_2 = arith.constant 0 : index
    %c0_3 = arith.constant 0 : index
    %4 = vector.load %arg7[%c0_2, %c0_3] : memref<128x17xf32, #tpu.memory_space<vmem>>, vector<128x17xf32>
    %c0_4 = arith.constant 0 : index
    %c0_5 = arith.constant 0 : index
    %5 = vector.load %arg4[%c0_4, %c0_5] : memref<64x17xf32, #tpu.memory_space<vmem>>, vector<64x17xf32>
    %cst = arith.constant dense<0.000000e+00> : vector<128x17xf32>
    %6 = tpu.matmul %3, %5, %cst {dimension_numbers = #tpu.dot_dimension_numbers<[1], [0], [0], [1], [0, 0, 1, 1], [], []>} : vector<128x64xf32>, vector<64x17xf32>, vector<128x17xf32> -> vector<128x17xf32>
    %7 = arith.addf %4, %6 : vector<128x17xf32>
    %c0_6 = arith.constant 0 : index
    %c0_7 = arith.constant 0 : index
    %8 = vector.load %arg7[%c0_6, %c0_7] : memref<128x17xf32, #tpu.memory_space<vmem>>, vector<128x17xf32>
    tpu.vector_store %arg7[%c0_6, %c0_7], %7 {strides = array<i32>} : memref<128x17xf32, #tpu.memory_space<vmem>>, vector<128x17xf32>,
    %c0_8 = arith.constant 0 : index
    %c0_9 = arith.constant 0 : index
    %9 = vector.load %arg8[%c0_8, %c0_9] : memref<128x1xf32, #tpu.memory_space<vmem>>, vector<128x1xf32>
    %10 = arith.mulf %3, %3 : vector<128x64xf32>
    %c0_10 = arith.constant 0 : index
    %c0_11 = arith.constant 0 : index
    %11 = vector.load %arg5[%c0_10, %c0_11] : memref<64x1xf32, #tpu.memory_space<vmem>>, vector<64x1xf32>
    %cst_12 = arith.constant dense<0.000000e+00> : vector<128x1xf32>
    %12 = tpu.matmul %10, %11, %cst_12 {dimension_numbers = #tpu.dot_dimension_numbers<[1], [0], [0], [1], [0, 0, 1, 1], [], []>} : vector<128x64xf32>, vector<64x1xf32>, vector<128x1xf32> -> vector<128x1xf32>
    %13 = arith.addf %9, %12 : vector<128x1xf32>
    %c0_13 = arith.constant 0 : index
    %c0_14 = arith.constant 0 : index
    %14 = vector.load %arg8[%c0_13, %c0_14] : memref<128x1xf32, #tpu.memory_space<vmem>>, vector<128x1xf32>
    tpu.vector_store %arg8[%c0_13, %c0_14], %13 {strides = array<i32>} : memref<128x1xf32, #tpu.memory_space<vmem>>, vector<128x1xf32>,
    %c0_i32_15 = arith.constant 0 : i32
    %15 = arith.cmpi eq, %arg1, %c0_i32_15 : i32
    %16 = arith.extui %15 : i1 to i32
    %c0_i32_16 = arith.constant 0 : i32
    %17 = arith.cmpi ne, %16, %c0_i32_16 : i32
    scf.if %17 {
      %c0_17 = arith.constant 0 : index
      %c0_18 = arith.constant 0 : index
      %18 = vector.load %arg7[%c0_17, %c0_18] : memref<128x17xf32, #tpu.memory_space<vmem>>, vector<128x17xf32>
      %19 = vector.extract_strided_slice %18 {offsets = [0, 0], sizes = [128, 1], strides = [1, 1]} : vector<128x17xf32> to vector<128x1xf32>
      %20 = arith.mulf %18, %18 : vector<128x17xf32>
      %cst_19 = arith.constant dense<0.000000e+00> : vector<128xf32>
      %21 = vector.multi_reduction <add>, %20, %cst_19 [1] : vector<128x17xf32> to vector<128xf32>
      %22 = vector.shape_cast %21 : vector<128xf32> to vector<128x1xf32>
      %23 = arith.mulf %19, %19 : vector<128x1xf32>
      %24 = arith.subf %22, %23 : vector<128x1xf32>
      %c0_20 = arith.constant 0 : index
      %c0_21 = arith.constant 0 : index
      %25 = vector.load %arg8[%c0_20, %c0_21] : memref<128x1xf32, #tpu.memory_space<vmem>>, vector<128x1xf32>
      %26 = arith.subf %24, %25 : vector<128x1xf32>
      %c0_22 = arith.constant 0 : index
      %c0_23 = arith.constant 0 : index
      %27 = memref.load %arg2[%c0_22, %c0_23] : memref<1x1xf32, #tpu.memory_space<smem>>
      %28 = vector.broadcast %27 : f32 to vector<128x1xf32>
      %29 = arith.addf %19, %28 : vector<128x1xf32>
      %cst_24 = arith.constant 5.000000e-01 : f32
      %30 = vector.broadcast %cst_24 : f32 to vector<128x1xf32>
      %31 = arith.mulf %30, %26 : vector<128x1xf32>
      %32 = arith.addf %29, %31 : vector<128x1xf32>
      %c0_25 = arith.constant 0 : index
      %c0_26 = arith.constant 0 : index
      %33 = vector.load %arg6[%c0_25, %c0_26] : memref<128x1xf32, #tpu.memory_space<vmem>>, vector<128x1xf32>
      tpu.vector_store %arg6[%c0_25, %c0_26], %32 {strides = array<i32>} : memref<128x1xf32, #tpu.memory_space<vmem>>, vector<128x1xf32>,
    } else {
    }
    return
  }
  func.func @transform_0(%arg0: i32, %arg1: i32) -> (i32, i32) {
    %c0_i32 = arith.constant 0 : i32
    %c0_i32_0 = arith.constant 0 : i32
    %c0_i32_1 = arith.constant 0 : i32
    return %c0_i32, %c0_i32_0 : i32, i32
  }
  func.func @transform_1(%arg0: i32, %arg1: i32) -> (i32, i32) {
    %c0_i32 = arith.constant 0 : i32
    return %arg0, %arg1 : i32, i32
  }
  func.func @transform_2(%arg0: i32, %arg1: i32) -> (i32, i32) {
    %c0_i32 = arith.constant 0 : i32
    %c0_i32_0 = arith.constant 0 : i32
    return %arg1, %c0_i32 : i32, i32
  }
  func.func @transform_3(%arg0: i32, %arg1: i32) -> (i32, i32) {
    %c0_i32 = arith.constant 0 : i32
    %c0_i32_0 = arith.constant 0 : i32
    return %arg1, %c0_i32 : i32, i32
  }
  func.func @transform_4(%arg0: i32, %arg1: i32) -> (i32, i32) {
    %c0_i32 = arith.constant 0 : i32
    %c0_i32_0 = arith.constant 0 : i32
    return %arg0, %c0_i32 : i32, i32
  }
}

module attributes {stable_mosaic.version = 11 : i64} {
  func.func @fm_kernel(%arg0: i32, %arg1: i32, %arg2: memref<1x1xf32, #tpu.memory_space<smem>>, %arg3: memref<128x64xf32, #tpu.memory_space<vmem>>, %arg4: memref<64x17xf32, #tpu.memory_space<vmem>>, %arg5: memref<64x1xf32, #tpu.memory_space<vmem>>, %arg6: memref<128x1xf32, #tpu.memory_space<vmem>>, %arg7: memref<128x17xf32, #tpu.memory_space<vmem>>, %arg8: memref<128x1xf32, #tpu.memory_space<vmem>>) attributes {dimension_semantics = [#tpu.dimension_semantics<parallel>, #tpu.dimension_semantics<arbitrary>], iteration_bounds = array<i64: 3, 1>, scalar_prefetch = 0 : i64, scratch_operands = 2 : i64, tpu.core_type = #tpu.core_type<tc>, window_params = [{transform_indices = @transform_0, window_bounds = array<i64: 1, 1>}, {transform_indices = @transform_1, window_bounds = array<i64: 128, 64>}, {transform_indices = @transform_2, window_bounds = array<i64: 64, 17>}, {transform_indices = @transform_3, window_bounds = array<i64: 64, 1>}, {transform_indices = @transform_4, window_bounds = array<i64: 128, 1>}]} {
    %c0_i32 = arith.constant 0 : i32
    %0 = arith.cmpi eq, %arg1, %c0_i32 : i32
    %1 = arith.extui %0 : i1 to i32
    %c0_i32_0 = arith.constant 0 : i32
    %2 = arith.cmpi ne, %1, %c0_i32_0 : i32
    scf.if %2 {
      %cst_17 = arith.constant 0.000000e+00 : f32
      %18 = vector.broadcast %cst_17 : f32 to vector<128x17xf32>
      %c0_18 = arith.constant 0 : index
      %c0_19 = arith.constant 0 : index
      %19 = vector.load %arg7[%c0_18, %c0_19] : memref<128x17xf32, #tpu.memory_space<vmem>>, vector<128x17xf32>
      tpu.vector_store %arg7[%c0_18, %c0_19], %18 {strides = array<i32>} : memref<128x17xf32, #tpu.memory_space<vmem>>, vector<128x17xf32>,
      %cst_20 = arith.constant 0.000000e+00 : f32
      %20 = vector.broadcast %cst_20 : f32 to vector<128x1xf32>
      %c0_21 = arith.constant 0 : index
      %c0_22 = arith.constant 0 : index
      %21 = vector.load %arg8[%c0_21, %c0_22] : memref<128x1xf32, #tpu.memory_space<vmem>>, vector<128x1xf32>
      tpu.vector_store %arg8[%c0_21, %c0_22], %20 {strides = array<i32>} : memref<128x1xf32, #tpu.memory_space<vmem>>, vector<128x1xf32>,
    } else {
    }
    %c0 = arith.constant 0 : index
    %c0_1 = arith.constant 0 : index
    %3 = vector.load %arg3[%c0, %c0_1] : memref<128x64xf32, #tpu.memory_space<vmem>>, vector<128x64xf32>
    %c0_2 = arith.constant 0 : index
    %c0_3 = arith.constant 0 : index
    %4 = vector.load %arg7[%c0_2, %c0_3] : memref<128x17xf32, #tpu.memory_space<vmem>>, vector<128x17xf32>
    %c0_4 = arith.constant 0 : index
    %c0_5 = arith.constant 0 : index
    %5 = vector.load %arg4[%c0_4, %c0_5] : memref<64x17xf32, #tpu.memory_space<vmem>>, vector<64x17xf32>
    %cst = arith.constant dense<0.000000e+00> : vector<128x17xf32>
    %6 = tpu.matmul %3, %5, %cst {dimension_numbers = #tpu.dot_dimension_numbers<[1], [0], [0], [1], [0, 0, 1, 1], [], []>} : vector<128x64xf32>, vector<64x17xf32>, vector<128x17xf32> -> vector<128x17xf32>
    %7 = arith.addf %4, %6 : vector<128x17xf32>
    %c0_6 = arith.constant 0 : index
    %c0_7 = arith.constant 0 : index
    %8 = vector.load %arg7[%c0_6, %c0_7] : memref<128x17xf32, #tpu.memory_space<vmem>>, vector<128x17xf32>
    tpu.vector_store %arg7[%c0_6, %c0_7], %7 {strides = array<i32>} : memref<128x17xf32, #tpu.memory_space<vmem>>, vector<128x17xf32>,
    %c0_8 = arith.constant 0 : index
    %c0_9 = arith.constant 0 : index
    %9 = vector.load %arg8[%c0_8, %c0_9] : memref<128x1xf32, #tpu.memory_space<vmem>>, vector<128x1xf32>
    %10 = arith.mulf %3, %3 : vector<128x64xf32>
    %c0_10 = arith.constant 0 : index
    %c0_11 = arith.constant 0 : index
    %11 = vector.load %arg5[%c0_10, %c0_11] : memref<64x1xf32, #tpu.memory_space<vmem>>, vector<64x1xf32>
    %cst_12 = arith.constant dense<0.000000e+00> : vector<128x1xf32>
    %12 = tpu.matmul %10, %11, %cst_12 {dimension_numbers = #tpu.dot_dimension_numbers<[1], [0], [0], [1], [0, 0, 1, 1], [], []>} : vector<128x64xf32>, vector<64x1xf32>, vector<128x1xf32> -> vector<128x1xf32>
    %13 = arith.addf %9, %12 : vector<128x1xf32>
    %c0_13 = arith.constant 0 : index
    %c0_14 = arith.constant 0 : index
    %14 = vector.load %arg8[%c0_13, %c0_14] : memref<128x1xf32, #tpu.memory_space<vmem>>, vector<128x1xf32>
    tpu.vector_store %arg8[%c0_13, %c0_14], %13 {strides = array<i32>} : memref<128x1xf32, #tpu.memory_space<vmem>>, vector<128x1xf32>,
    %c0_i32_15 = arith.constant 0 : i32
    %15 = arith.cmpi eq, %arg1, %c0_i32_15 : i32
    %16 = arith.extui %15 : i1 to i32
    %c0_i32_16 = arith.constant 0 : i32
    %17 = arith.cmpi ne, %16, %c0_i32_16 : i32
    scf.if %17 {
      %c0_17 = arith.constant 0 : index
      %c0_18 = arith.constant 0 : index
      %18 = vector.load %arg7[%c0_17, %c0_18] : memref<128x17xf32, #tpu.memory_space<vmem>>, vector<128x17xf32>
      %19 = vector.extract_strided_slice %18 {offsets = [0, 0], sizes = [128, 1], strides = [1, 1]} : vector<128x17xf32> to vector<128x1xf32>
      %20 = arith.mulf %18, %18 : vector<128x17xf32>
      %cst_19 = arith.constant dense<0.000000e+00> : vector<128xf32>
      %21 = vector.multi_reduction <add>, %20, %cst_19 [1] : vector<128x17xf32> to vector<128xf32>
      %22 = vector.shape_cast %21 : vector<128xf32> to vector<128x1xf32>
      %23 = arith.mulf %19, %19 : vector<128x1xf32>
      %24 = arith.subf %22, %23 : vector<128x1xf32>
      %c0_20 = arith.constant 0 : index
      %c0_21 = arith.constant 0 : index
      %25 = vector.load %arg8[%c0_20, %c0_21] : memref<128x1xf32, #tpu.memory_space<vmem>>, vector<128x1xf32>
      %26 = arith.subf %24, %25 : vector<128x1xf32>
      %c0_22 = arith.constant 0 : index
      %c0_23 = arith.constant 0 : index
      %27 = memref.load %arg2[%c0_22, %c0_23] : memref<1x1xf32, #tpu.memory_space<smem>>
      %28 = vector.broadcast %27 : f32 to vector<128x1xf32>
      %29 = arith.addf %19, %28 : vector<128x1xf32>
      %cst_24 = arith.constant 5.000000e-01 : f32
      %30 = vector.broadcast %cst_24 : f32 to vector<128x1xf32>
      %31 = arith.mulf %30, %26 : vector<128x1xf32>
      %32 = arith.addf %29, %31 : vector<128x1xf32>
      %c0_25 = arith.constant 0 : index
      %c0_26 = arith.constant 0 : index
      %33 = vector.load %arg6[%c0_25, %c0_26] : memref<128x1xf32, #tpu.memory_space<vmem>>, vector<128x1xf32>
      tpu.vector_store %arg6[%c0_25, %c0_26], %32 {strides = array<i32>} : memref<128x1xf32, #tpu.memory_space<vmem>>, vector<128x1xf32>,
    } else {
    }
    return
  }
  func.func @transform_0(%arg0: i32, %arg1: i32) -> (i32, i32) {
    %c0_i32 = arith.constant 0 : i32
    %c0_i32_0 = arith.constant 0 : i32
    %c0_i32_1 = arith.constant 0 : i32
    return %c0_i32, %c0_i32_0 : i32, i32
  }
  func.func @transform_1(%arg0: i32, %arg1: i32) -> (i32, i32) {
    %c0_i32 = arith.constant 0 : i32
    return %arg0, %arg1 : i32, i32
  }
  func.func @transform_2(%arg0: i32, %arg1: i32) -> (i32, i32) {
    %c0_i32 = arith.constant 0 : i32
    %c0_i32_0 = arith.constant 0 : i32
    return %arg1, %c0_i32 : i32, i32
  }
  func.func @transform_3(%arg0: i32, %arg1: i32) -> (i32, i32) {
    %c0_i32 = arith.constant 0 : i32
    %c0_i32_0 = arith.constant 0 : i32
    return %arg1, %c0_i32 : i32, i32
  }
  func.func @transform_4(%arg0: i32, %arg1: i32) -> (i32, i32) {
    %c0_i32 = arith.constant 0 : i32
    %c0_i32_0 = arith.constant 0 : i32
    return %arg0, %c0_i32 : i32, i32
  }
}

</mosaic_0001>

<bundles_post_ra>
// kernel: tpu_custom_call.1
= control target key start
LH: loop header
LB: loop body
LE: loop exit
PB: predicated region body
PF: predicated region fallthrough
CT: control target
= control target key end

     0   :  { %s2396_s0 = inlined_call_operand.<no memory space> [shape: f32[1,1], index: 0, kind: input, shape index: {}]   ;;  %s2397_s1 = inlined_call_operand.vmem [shape: f32[300,64], index: 1, kind: input, shape index: {}]   ;;  %s2398_s2 = inlined_call_operand.vmem [shape: f32[64,17], index: 2, kind: input, shape index: {}]   ;;  %s2399_s3 = inlined_call_operand.vmem [shape: f32[64,1], index: 3, kind: input, shape index: {}]   ;;  %s2400_s4 = inlined_call_operand.vmem [shape: f32[300,1], index: 4, kind: output, shape index: {}]  }
   0x1   :  { %9 = sst [smem:[#allocation4]] %s2396_s0 }
   0x2   :  { %s1831_s17 = smov 0   ;;  %s1833_s18 = smov 0  }
   0x3   :  { %s1835_s19 = smov 0   ;;  %s1837_s20 = smov 0  }
   0x4   :  { %s1839_s21 = smov 0  }
   0x5 LB: > { %s1371_s0 = sadd.s32 4294967295, %s1768_s21   ;;  %s27_s22 = sadd.s32 1, %s1764_s20  ;;  %s1768_s21 = sphi %s1839_s21, %s15_s21   ;;  %s1764_s20 = sphi %s1837_s20, %s2408_s20   ;;  %s1760_s19 = sphi %s1835_s19, %s2407_s19   ;;  %s1756_s18 = sphi %s1833_s18, %s2406_s18   ;;  %s1752_s17 = sphi %s1831_s17, %s2405_s17  }
   0x6   : > { %p29_p0 = scmp.ge.s32.totalorder %s27_s22, 3  ;;  %s135_s23 = sadd.s32 1, %s1756_s18 }
   0x7   : > { %p145_p1 = scmp.ne.s32.totalorder %s1756_s18, %s1752_s17  ;;  %p146_p2 = scmp.eq.s32.totalorder %s1371_s0, 2 }
   0x8   : > { %s2410_s22 = smov (%p29_p0, %s27_s22), 0  ;;  %p1377_p4 = scmp.ge.s32.totalorder %s1768_s21, 1 }
   0x9   : > { %p1863_p3 = por %p146_p2, %p145_p1  ;;  %s132_s25 = ssub.s32 %s1764_s20, %s2410_s22 }
   0xa   : > { %p211_p5 = scmp.lt.s32.totalorder %s1768_s21, 4  ;;  %p133_p6 = scmp.eq.s32.totalorder %s132_s25, 0 }
   0xc   : > { %p212_p7 = pnand %p1377_p4, %p211_p5 }
   0xd   : > { %s1872_s26 = scalar_select %p133_p6, %s1756_s18, %s135_s23  }
   0xe   : > { %215 = sbr.rel (%p212_p7) target bundleno = 490 (0x1ea), region = 36  ;;  %v357_v0 = vld [vmem:[%s2398_s2] sm:$0xff] (!%p212_p7)  ;;  %v358_v1 = vld [vmem:[%s2398_s2 + $0x8] sm:$0xff] (!%p212_p7)  ;;  %v359_v2 = vld [vmem:[%s2398_s2 + $0x10] sm:$0xff] (!%p212_p7)  ;;  %s1884_s7 = sshll.u32 (!%p212_p7), %s1760_s19, 4  ;;  %vm291_vm0 = vcmask (!%p212_p7), 138240  }
   0xf   : > { %v1561_v3 = vpack.c.bf16 (!%p212_p7), %v358_v1, %v357_v0  ;;  %v360_v4 = vld [vmem:[%s2398_s2 + $0x18] sm:$0xff] (!%p212_p7)  ;;  %p258_p8 = scmp.lt.s32.totalorder (!%p212_p7), %s1884_s7, 37  ;;  %v361_v6 = vld [vmem:[%s2398_s2 + $0x20] sm:$0xff] (!%p212_p7)  ;;  %v362_v7 = vld [vmem:[%s2398_s2 + $0x28] sm:$0xff] (!%p212_p7)  ;;  %v1802_v9 = vmov (!%p212_p7), 0.0   ;;  %vm365_vm1 = vcmask (!%p212_p7), 523264  }
  0x10   : > { %v1565_v5 = vpack.c.bf16 (!%p212_p7), %v360_v4, %v359_v2  ;;  %v624_v8 = vld [vmem:[%s2399_s3] sm:$0xff] (!%p212_p7)  ;;  %293 = vst.msk [vmem:[#allocation2 + $0x8] sm:$0xff] (!%p212_p7), %vm291_vm0, %v1802_v9  ;;  %292 = vst.msk [vmem:[#allocation2] sm:$0xff] (!%p212_p7), %vm291_vm0, %v1802_v9  ;;  %v625_v10 = vld [vmem:[%s2399_s3 + $0x8] sm:$0xff] (!%p212_p7)  ;;  %v1569_v14 = vpack.c.bf16 (!%p212_p7), %v362_v7, %v361_v6  ;;  %vm308_vm2 = vcmask (!%p212_p7), 7168   ;;  %s989_s28 = sld [smem:[#allocation4]] (!%p212_p7) }
  0x11   : > { %294 = vst.msk [vmem:[#allocation2 + $0x10] sm:$0xff] (!%p212_p7), %vm291_vm0, %v1802_v9  ;;  %295 = vst.msk [vmem:[#allocation2 + $0x18] sm:$0xff] (!%p212_p7), %vm291_vm0, %v1802_v9  ;;  %1562 = vmatprep.subr.bf16.mxu0 (!%p212_p7), %v1561_v3  ;;  %v626_v11 = vld [vmem:[%s2399_s3 + $0x10] sm:$0xff] (!%p212_p7)  ;;  %v627_v12 = vld [vmem:[%s2399_s3 + $0x18] sm:$0xff] (!%p212_p7)  ;;  %v1577_v13 = vpack.c.bf16 (!%p212_p7), %v625_v10, %v624_v8  ;;  %s250_s29 = sand.u32 (!%p212_p7), 1, %s1752_s17  }
  0x12   : > { %296 = vst.msk [vmem:[#allocation2 + $0x20] sm:$0xff] (!%p212_p7), %vm291_vm0, %v1802_v9  ;;  %297 = vst.msk [vmem:[#allocation2 + $0x28] sm:$0xff] (!%p212_p7), %vm291_vm0, %v1802_v9  ;;  %1564 = vmatpush3.bf16.msra.mxu0 (!%p212_p7), %v1561_v3  ;;  %v1581_v15 = vpack.c.bf16 (!%p212_p7), %v627_v12, %v626_v11  ;;  %v628_v16 = vld [vmem:[%s2399_s3 + $0x20] sm:$0xff] (!%p212_p7)  ;;  %v629_v17 = vld [vmem:[%s2399_s3 + $0x28] sm:$0xff] (!%p212_p7) }
  0x13   : > { %298 = vst.msk [vmem:[#allocation2 + $0x30] sm:$0xff] (!%p212_p7), %vm291_vm0, %v1802_v9  ;;  %299 = vst.msk [vmem:[#allocation2 + $0x38] sm:$0xff] (!%p212_p7), %vm291_vm0, %v1802_v9  ;;  %1566 = vmatprep.subr.bf16.mxu0 (!%p212_p7), %v1565_v5  ;;  %v363_v18 = vld [vmem:[%s2398_s2 + $0x30] sm:$0xff] (!%p212_p7)  ;;  %v364_v19 = vld [vmem:[%s2398_s2 + $0x38] sm:$0xff] (!%p212_p7)  ;;  %1578 = vmatprep.subr.bf16.mxu1 (!%p212_p7), %v1577_v13  ;;  %v1585_v21 = vpack.c.bf16 (!%p212_p7), %v629_v17, %v628_v16 }
  0x14   : > { %300 = vst.msk [vmem:[#allocation2 + $0x40] sm:$0xff] (!%p212_p7), %vm291_vm0, %v1802_v9  ;;  %301 = vst.msk [vmem:[#allocation2 + $0x48] sm:$0xff] (!%p212_p7), %vm291_vm0, %v1802_v9  ;;  %1580 = vmatpush3.bf16.msra.mxu1 (!%p212_p7), %v1577_v13  ;;  %v1573_v23 = vpack.c.bf16 (!%p212_p7), %v364_v19, %v363_v18  ;;  %v630_v24 = vld [vmem:[%s2399_s3 + $0x30] sm:$0xff] (!%p212_p7)  ;;  %v631_v25 = vld [vmem:[%s2399_s3 + $0x38] sm:$0xff] (!%p212_p7) }
  0x15   : > { %302 = vst.msk [vmem:[#allocation2 + $0x50] sm:$0xff] %vm291_vm0, %v1802_v9  ;;  %303 = vst.msk [vmem:[#allocation2 + $0x58] sm:$0xff] %vm291_vm0, %v1802_v9  ;;  %s259_s16 = scalar_select %p258_p8, %s1884_s7, 37  ;;  %1582 = vmatprep.subr.bf16.mxu1 %v1581_v15  ;;  %v1589_v26 = vpack.c.bf16 %v631_v25, %v630_v24 }
  0x16   : > { %304 = vst.msk [vmem:[#allocation2 + $0x60] sm:$0xff] %vm291_vm0, %v1802_v9  ;;  %305 = vst.msk [vmem:[#allocation2 + $0x68] sm:$0xff] %vm291_vm0, %v1802_v9  ;;  %1568 = vmatpush3.bf16.msra.mxu0 %v1565_v5  ;;  %s1063_s5 = ssub.s32 (%p1863_p3), 38, %s1884_s7  ;;  %s1430_s6 = sshll.u32 (%p1863_p3), %s1760_s19, 7 }
  0x17   : > { %306 = vst.msk [vmem:[#allocation2 + $0x70] sm:$0xff] %vm291_vm0, %v1802_v9  ;;  %307 = vst.msk [vmem:[#allocation2 + $0x78] sm:$0xff] %vm291_vm0, %v1802_v9  ;;  %s1380_s30 = sshll.u32 %s259_s16, 3  ;;  %1570 = vmatprep.subr.bf16.mxu0 %v1569_v14  ;;  %v342_v57 = vld [vmem:[#allocation2 + $0x8] sm:$0xff]  ;;  %v341_v58 = vld [vmem:[#allocation2] sm:$0xff]  ;;  %p1064_p9 = scmp.lt.s32.totalorder (%p1863_p3), %s1063_s5, 16 }
  0x18   : > { %s1958_s16 = scalar_lea.vmem %s2397_s1, %s1380_s30  ;;  %1584 = vmatpush3.bf16.msra.mxu1 %v1581_v15  ;;  %310 = vst.msk [vmem:[#allocation3 + $0x8] sm:$0xff] %vm308_vm2, %v1802_v9  ;;  %309 = vst.msk [vmem:[#allocation3] sm:$0xff] %vm308_vm2, %v1802_v9  ;;  %v344_v0 = vld [vmem:[#allocation2 + $0x18] sm:$0xff]  ;;  %v343_v2 = vld [vmem:[#allocation2 + $0x10] sm:$0xff]  ;;  %s1378_s30 = sshll.u32 %s250_s29, 7 }
  0x19   : > { %v325_v20 = vld [vmem:[%s1958_s16] sm:$0xff]  ;;  %1586 = vmatprep.subr.bf16.mxu1 %v1585_v21  ;;  %v326_v27 = vld [vmem:[%s1958_s16 + $0x8] sm:$0xff]  ;;  %v327_v28 = vld [vmem:[%s1958_s16 + $0x10] sm:$0xff]  ;;  %311 = vst.msk [vmem:[#allocation3 + $0x10] sm:$0xff] %vm308_vm2, %v1802_v9  ;;  %s2218_s17 = scalar_lea.vmem [#allocation5], %s1378_s30   ;;  %s2298_s10 = scalar_lea.vmem (%p1863_p3), %s2400_s4, %s1430_s6  }
  0x1a   : > { %1497 = vmatprep.mubr.msk.f32.mxu0 %vm365_vm1, %v325_v20  ;;  %v608_v22 = vmul.f32 %v325_v20, %v325_v20  ;;  %1572 = vmatpush3.bf16.msra.mxu0 %v1569_v14  ;;  %v609_v29 = vmul.f32 %v326_v27, %v326_v27  ;;  %v610_v30 = vmul.f32 %v327_v28, %v327_v28  ;;  %v328_v31 = vld [vmem:[%s1958_s16 + $0x18] sm:$0xff]  ;;  %v329_v32 = vld [vmem:[%s1958_s16 + $0x20] sm:$0xff]  ;;  %v330_v35 = vld [vmem:[%s1958_s16 + $0x28] sm:$0xff] }
  0x1b   : > { %1574 = vmatprep.subr.bf16.mxu0 %v1573_v23  ;;  %v611_v33 = vmul.f32 %v328_v31, %v328_v31  ;;  %v612_v34 = vmul.f32 %v329_v32, %v329_v32  ;;  %v331_v36 = vld [vmem:[%s1958_s16 + $0x30] sm:$0xff]  ;;  %v613_v37 = vmul.f32 %v330_v35, %v330_v35  ;;  %v332_v39 = vld [vmem:[%s1958_s16 + $0x38] sm:$0xff]  ;;  %v333_v40 = vld [vmem:[%s1958_s16 + $0x40] sm:$0xff]  ;;  %312 = vst.msk [vmem:[#allocation3 + $0x18] sm:$0xff] %vm308_vm2, %v1802_v9 }
  0x1c   : > { %1537 = vmatprep.mubr.msk.f32.mxu1 %vm365_vm1, %v608_v22  ;;  %1588 = vmatpush3.bf16.msra.mxu1 %v1585_v21  ;;  %v614_v38 = vmul.f32 %v331_v36, %v331_v36  ;;  %v615_v41 = vmul.f32 %v332_v39, %v332_v39  ;;  %v616_v42 = vmul.f32 %v333_v40, %v333_v40  ;;  %v334_v43 = vld [vmem:[%s1958_s16 + $0x48] sm:$0xff]  ;;  %v335_v44 = vld [vmem:[%s1958_s16 + $0x50] sm:$0xff]  ;;  %v336_v47 = vld [vmem:[%s1958_s16 + $0x58] sm:$0xff] }
  0x1d   : > { %1590 = vmatprep.subr.bf16.mxu1 %v1589_v26  ;;  %v617_v45 = vmul.f32 %v334_v43, %v334_v43  ;;  %v618_v46 = vmul.f32 %v335_v44, %v335_v44  ;;  %v337_v48 = vld [vmem:[%s1958_s16 + $0x60] sm:$0xff]  ;;  %v619_v49 = vmul.f32 %v336_v47, %v336_v47  ;;  %v338_v51 = vld [vmem:[%s1958_s16 + $0x68] sm:$0xff]  ;;  %v339_v52 = vld [vmem:[%s1958_s16 + $0x70] sm:$0xff]  ;;  %313 = vst.msk [vmem:[#allocation3 + $0x20] sm:$0xff] %vm308_vm2, %v1802_v9 }
  0x1e   : > { %1576 = vmatpush3.bf16.msra.mxu0 %v1573_v23  ;;  %v620_v50 = vmul.f32 %v337_v48, %v337_v48  ;;  %v621_v53 = vmul.f32 %v338_v51, %v338_v51  ;;  %v622_v54 = vmul.f32 %v339_v52, %v339_v52  ;;  %v340_v55 = vld [vmem:[%s1958_s16 + $0x78] sm:$0xff]  ;;  %314 = vst.msk [vmem:[#allocation3 + $0x28] sm:$0xff] %vm308_vm2, %v1802_v9  ;;  %315 = vst.msk [vmem:[#allocation3 + $0x30] sm:$0xff] %vm308_vm2, %v1802_v9  ;;  %v346_v12 = vld [vmem:[#allocation2 + $0x28] sm:$0xff] }
  0x1f   : > { %v623_v56 = vmul.f32 %v340_v55, %v340_v55  ;;  %316 = vst.msk [vmem:[#allocation3 + $0x38] sm:$0xff] %vm308_vm2, %v1802_v9  ;;  %317 = vst.msk [vmem:[#allocation3 + $0x40] sm:$0xff] %vm308_vm2, %v1802_v9  ;;  %v593_v62 = vld [vmem:[#allocation3 + $0x8] sm:$0xff]  ;;  %v592_v1 = vld [vmem:[#allocation3] sm:$0xff] }
  0x20   : > { %1592 = vmatpush3.bf16.msra.mxu1 %v1589_v26  ;;  %318 = vst.msk [vmem:[#allocation3 + $0x48] sm:$0xff] %vm308_vm2, %v1802_v9  ;;  %319 = vst.msk [vmem:[#allocation3 + $0x50] sm:$0xff] %vm308_vm2, %v1802_v9  ;;  %v594_v13 = vld [vmem:[#allocation3 + $0x10] sm:$0xff]  ;;  %v345_v14 = vld [vmem:[#allocation2 + $0x20] sm:$0xff] }
  0x21   : > { %1498 = vmatmul.mubr.msk.f32.vlgmr.msra.gmra.mrb[0].mxu0 %vm365_vm1, %v326_v27  ;;  %320 = vst.msk [vmem:[#allocation3 + $0x58] sm:$0xff] %vm308_vm2, %v1802_v9  ;;  %321 = vst.msk [vmem:[#allocation3 + $0x60] sm:$0xff] %vm308_vm2, %v1802_v9  ;;  %v348_v24 = vld [vmem:[#allocation2 + $0x38] sm:$0xff]  ;;  %v347_v26 = vld [vmem:[#allocation2 + $0x30] sm:$0xff] }
  0x22   : > { %1500 = vmatprep.mubr.msk.f32.mxu0 %vm365_vm1, %v327_v28  ;;  %322 = vst.msk [vmem:[#allocation3 + $0x68] sm:$0xff] %vm308_vm2, %v1802_v9  ;;  %323 = vst.msk [vmem:[#allocation3 + $0x70] sm:$0xff] %vm308_vm2, %v1802_v9  ;;  %v595_v10 = vld [vmem:[#allocation3 + $0x18] sm:$0xff] }
  0x23   : > { %1538 = vmatmul.mubr.msk.f32.vlgmr.msra.gmra.mrb[0].mxu1 %vm365_vm1, %v609_v29  ;;  %324 = vst.msk [vmem:[#allocation3 + $0x78] sm:$0xff] %vm308_vm2, %v1802_v9 }
  0x24   : > { %1540 = vmatprep.mubr.msk.f32.mxu1 %vm365_vm1, %v610_v30 }
  0x25   : > { %1501 = vmatmul.mubr.msk.f32.gmra.mrb[2].mxu0 %vm365_vm1, %v328_v31  ;;  %v597_v22 = vld [vmem:[#allocation3 + $0x28] sm:$0xff] }
  0x26   : > { %1503 = vmatprep.mubr.msk.f32.mxu0 %vm365_vm1, %v329_v32 }
  0x27   : > { %1541 = vmatmul.mubr.msk.f32.gmra.mrb[2].mxu1 %vm365_vm1, %v611_v33 }
  0x28   : > { %1543 = vmatprep.mubr.msk.f32.mxu1 %vm365_vm1, %v612_v34 }
  0x29   : > { %1504 = vmatmul.mubr.msk.f32.gmra.mrb[4].mxu0 %vm365_vm1, %v330_v35 }
  0x2a   : > { %1506 = vmatprep.mubr.msk.f32.mxu0 %vm365_vm1, %v331_v36 }
  0x2b   : > { %1544 = vmatmul.mubr.msk.f32.gmra.mrb[4].mxu1 %vm365_vm1, %v613_v37  ;;  %v350_v37 = vld [vmem:[#allocation2 + $0x48] sm:$0xff] }
  0x2c   : > { %1546 = vmatprep.mubr.msk.f32.mxu1 %vm365_vm1, %v614_v38 }
  0x2d   : > { %1507 = vmatmul.mubr.msk.f32.gmra.mrb[6].mxu0 %vm365_vm1, %v332_v39  ;;  %v349_v39 = vld [vmem:[#allocation2 + $0x40] sm:$0xff] }
  0x2e   : > { %1509 = vmatprep.mubr.msk.f32.mxu0 %vm365_vm1, %v333_v40 }
  0x2f   : > { %1547 = vmatmul.mubr.msk.f32.gmra.mrb[6].mxu1 %vm365_vm1, %v615_v41 }
  0x30   : > { %1549 = vmatprep.mubr.msk.f32.mxu1 %vm365_vm1, %v616_v42 }
  0x31   : > { %1510 = vmatmul.mubr.msk.f32.gmra.mrb[8].mxu0 %vm365_vm1, %v334_v43 }
  0x32   : > { %1512 = vmatprep.mubr.msk.f32.mxu0 %vm365_vm1, %v335_v44 }
  0x33   : > { %1550 = vmatmul.mubr.msk.f32.gmra.mrb[8].mxu1 %vm365_vm1, %v617_v45 }
  0x34   : > { %1552 = vmatprep.mubr.msk.f32.mxu1 %vm365_vm1, %v618_v46 }
  0x35   : > { %1513 = vmatmul.mubr.msk.f32.gmra.mrb[10].mxu0 %vm365_vm1, %v336_v47 }
  0x36   : > { %1515 = vmatprep.mubr.msk.f32.mxu0 %vm365_vm1, %v337_v48 }
  0x37   : > { %1553 = vmatmul.mubr.msk.f32.gmra.mrb[10].mxu1 %vm365_vm1, %v619_v49  ;;  %v352_v49 = vld [vmem:[#allocation2 + $0x58] sm:$0xff] }
  0x38   : > { %1555 = vmatprep.mubr.msk.f32.mxu1 %vm365_vm1, %v620_v50 }
  0x39   : > { %1516 = vmatmul.mubr.msk.f32.gmra.mrb[12].mxu0 %vm365_vm1, %v338_v51  ;;  %v351_v51 = vld [vmem:[#allocation2 + $0x50] sm:$0xff] }
  0x3a   : > { %1518 = vmatprep.mubr.msk.f32.mxu0 %vm365_vm1, %v339_v52 }
  0x3b   : > { %1556 = vmatmul.mubr.msk.f32.gmra.mrb[12].mxu1 %vm365_vm1, %v621_v53 }
  0x3c   : > { %1558 = vmatprep.mubr.msk.f32.mxu1 %vm365_vm1, %v622_v54 }
  0x3d   : > { %1519 = vmatmul.mubr.msk.f32.gmra.mrb[14].mxu0 %vm365_vm1, %v340_v55 }
  0x3f   : > { %1559 = vmatmul.mubr.msk.f32.gmra.mrb[14].mxu1 %vm365_vm1, %v623_v56 }
  0xf4   : > { %v1499_v59 = vpop.f32.mrb[0].mxu0 }
  0xf5   : > { %v560_v60 = vadd.f32 %v1499_v59, %v342_v57  ;;  %v480_v61 = vpop.f32.mrb[1].mxu0 }
  0xf6   : > { %v559_v63 = vadd.f32 %v480_v61, %v341_v58  ;;  %v1539_v3 = vpop.f32.mrb[0].mxu1  ;;  %v354_v61 = vld [vmem:[#allocation2 + $0x68] sm:$0xff] }
  0xf7   : > { %577 = vst.msk [vmem:[#allocation2 + $0x8] sm:$0xff] %vm291_vm0, %v560_v60  ;;  %v826_v5 = vadd.f32 %v1539_v3, %v593_v62  ;;  %v746_v6 = vpop.f32.mrb[1].mxu1 }
  0xf8   : > { %576 = vst.msk [vmem:[#allocation2] sm:$0xff] %vm291_vm0, %v559_v63  ;;  %v1502_v4 = vpop.f32.mrb[2].mxu0  ;;  %v825_v9 = vadd.f32 %v746_v6, %v592_v1  ;;  %v353_v63 = vld [vmem:[#allocation2 + $0x60] sm:$0xff] }
  0xf9   : > { %v562_v7 = vadd.f32 %v1502_v4, %v344_v0  ;;  %v490_v8 = vpop.f32.mrb[3].mxu0  ;;  %843 = vst.msk [vmem:[#allocation3 + $0x8] sm:$0xff] %vm308_vm2, %v826_v5 }
  0xfa   : > { %v561_v11 = vadd.f32 %v490_v8, %v343_v2  ;;  %842 = vst.msk [vmem:[#allocation3] sm:$0xff] %vm308_vm2, %v825_v9  ;;  %v1542_v15 = vpop.f32.mrb[2].mxu1  ;;  %v356_v9 = vld [vmem:[#allocation2 + $0x78] sm:$0xff] }
  0xfb   : > { %579 = vst.msk [vmem:[#allocation2 + $0x18] sm:$0xff] %vm291_vm0, %v562_v7  ;;  %v828_v17 = vadd.f32 %v1542_v15, %v595_v10  ;;  %v756_v18 = vpop.f32.mrb[3].mxu1 }
  0xfc   : > { %578 = vst.msk [vmem:[#allocation2 + $0x10] sm:$0xff] %vm291_vm0, %v561_v11  ;;  %v1505_v16 = vpop.f32.mrb[4].mxu0  ;;  %v827_v21 = vadd.f32 %v756_v18, %v594_v13  ;;  %v355_v11 = vld [vmem:[#allocation2 + $0x70] sm:$0xff] }
  0xfd   : > { %v564_v19 = vadd.f32 %v1505_v16, %v346_v12  ;;  %v500_v20 = vpop.f32.mrb[5].mxu0  ;;  %845 = vst.msk [vmem:[#allocation3 + $0x18] sm:$0xff] %vm308_vm2, %v828_v17  ;;  %v596_v17 = vld [vmem:[#allocation3 + $0x20] sm:$0xff] }
  0xfe   : > { %v563_v23 = vadd.f32 %v500_v20, %v345_v14  ;;  %v2052_v25 = vld [vmem:[#allocation2 + $0x8] sm:$0xff]  ;;  %844 = vst.msk [vmem:[#allocation3 + $0x10] sm:$0xff] %vm308_vm2, %v827_v21  ;;  %v1545_v29 = vpop.f32.mrb[4].mxu1 }
  0xff   : > { %581 = vst.msk [vmem:[#allocation2 + $0x28] sm:$0xff] %vm291_vm0, %v564_v19  ;;  %v2058_v27 = vmul.f32 %v2052_v25, %v2052_v25  ;;  %v2060_v28 = vld [vmem:[#allocation2] sm:$0xff]  ;;  %v830_v31 = vadd.f32 %v1545_v29, %v597_v22  ;;  %v766_v18 = vpop.f32.mrb[5].mxu1 }
 0x100   : > { %580 = vst.msk [vmem:[#allocation2 + $0x20] sm:$0xff] %vm291_vm0, %v563_v23  ;;  %v1508_v30 = vpop.f32.mrb[6].mxu0  ;;  %v2068_v35 = vmul.f32 %v2060_v28, %v2060_v28  ;;  %v829_v21 = vadd.f32 %v766_v18, %v596_v17  ;;  %v604_v18 = vld [vmem:[#allocation3 + $0x60] sm:$0xff] }
 0x101   : > { %v566_v32 = vadd.f32 %v1508_v30, %v348_v24  ;;  %v510_v33 = vpop.f32.mrb[7].mxu0  ;;  %v896_v34 = vsel %vm291_vm0, %v2058_v27, 0.0  ;;  %847 = vst.msk [vmem:[#allocation3 + $0x28] sm:$0xff] %vm308_vm2, %v830_v31 }
 0x102   : > { %v565_v36 = vadd.f32 %v510_v33, %v347_v26  ;;  %897 = vadd.xlane.f32.xlu0 %v896_v34  ;;  %v2070_v38 = vld [vmem:[#allocation2 + $0x18] sm:$0xff]  ;;  %v893_v45 = vsel %vm291_vm0, %v2068_v35, 0.0  ;;  %846 = vst.msk [vmem:[#allocation3 + $0x20] sm:$0xff] %vm308_vm2, %v829_v21  ;;  %v1548_v31 = vpop.f32.mrb[6].mxu1  ;;  %v598_v33 = vld [vmem:[#allocation3 + $0x30] sm:$0xff]  ;;  %v605_v21 = vld [vmem:[#allocation3 + $0x68] sm:$0xff] }
 0x103   : > { %583 = vst.msk [vmem:[#allocation2 + $0x38] sm:$0xff] %vm291_vm0, %v566_v32  ;;  %v2076_v40 = vmul.f32 %v2070_v38, %v2070_v38  ;;  %v2078_v41 = vld [vmem:[#allocation2 + $0x10] sm:$0xff]  ;;  %v776_v34 = vpop.f32.mrb[7].mxu1 }
 0x104   : > { %582 = vst.msk [vmem:[#allocation2 + $0x30] sm:$0xff] %vm291_vm0, %v565_v36  ;;  %v1511_v42 = vpop.f32.mrb[8].mxu0  ;;  %v2087_v47 = vmul.f32 %v2078_v41, %v2078_v41  ;;  %v831_v36 = vadd.f32 %v776_v34, %v598_v33  ;;  %v607_v34 = vld [vmem:[#allocation3 + $0x78] sm:$0xff] }
 0x105   : > { %v568_v43 = vadd.f32 %v1511_v42, %v350_v37  ;;  %v520_v44 = vpop.f32.mrb[9].mxu0  ;;  %v902_v46 = vsel %vm291_vm0, %v2076_v40, 0.0  ;;  %v599_v42 = vld [vmem:[#allocation3 + $0x38] sm:$0xff] }
 0x106   : > { %v567_v48 = vadd.f32 %v520_v44, %v349_v39  ;;  %894 = vadd.xlane.f32.xlu0 %v893_v45  ;;  %903 = vadd.xlane.f32.xlu1 %v902_v46  ;;  %v2089_v50 = vld [vmem:[#allocation2 + $0x28] sm:$0xff]  ;;  %v899_v58 = vsel %vm291_vm0, %v2087_v47, 0.0  ;;  %v832_v46 = vadd.f32 %v1548_v31, %v599_v42  ;;  %848 = vst.msk [vmem:[#allocation3 + $0x30] sm:$0xff] %vm308_vm2, %v831_v36 }
 0x107   : > { %585 = vst.msk [vmem:[#allocation2 + $0x48] sm:$0xff] %vm291_vm0, %v568_v43  ;;  %v2092_v52 = vld [vmem:[#allocation2 + $0x20] sm:$0xff]  ;;  %v2096_v53 = vmul.f32 %v2089_v50, %v2089_v50 }
 0x108   : > { %584 = vst.msk [vmem:[#allocation2 + $0x40] sm:$0xff] %vm291_vm0, %v567_v48  ;;  %v1514_v54 = vpop.f32.mrb[10].mxu0  ;;  %v2101_v55 = vmul.f32 %v2092_v52, %v2092_v52  ;;  %v1551_v48 = vpop.f32.mrb[8].mxu1 }
 0x109   : > { %v570_v56 = vadd.f32 %v1514_v54, %v352_v49  ;;  %v530_v57 = vpop.f32.mrb[11].mxu0  ;;  %v908_v0 = vsel %vm291_vm0, %v2096_v53, 0.0  ;;  %v786_v54 = vpop.f32.mrb[9].mxu1  ;;  %849 = vst.msk [vmem:[#allocation3 + $0x38] sm:$0xff] %vm308_vm2, %v832_v46  ;;  %v2208_v46 = vstv %s989_s28 }
 0x10a   : > { %v569_v59 = vadd.f32 %v530_v57, %v351_v51  ;;  %900 = vadd.xlane.f32.xlu1 %v899_v58  ;;  %v905_v60 = vsel %vm291_vm0, %v2101_v55, 0.0  ;;  %v2107_v62 = vld [vmem:[#allocation2 + $0x38] sm:$0xff]  ;;  %v600_v51 = vld [vmem:[#allocation3 + $0x40] sm:$0xff] }
 0x10b   : > { %587 = vst.msk [vmem:[#allocation2 + $0x58] sm:$0xff] %vm291_vm0, %v570_v56  ;;  %906 = vadd.xlane.f32.xlu0 %v905_v60  ;;  %v2112_v1 = vld [vmem:[#allocation2 + $0x30] sm:$0xff]  ;;  %v2116_v2 = vmul.f32 %v2107_v62, %v2107_v62  ;;  %v833_v56 = vadd.f32 %v786_v54, %v600_v51  ;;  %v957_v51 = vld [vmem:[#allocation3] sm:$0xff] }
 0x10c   : > { %586 = vst.msk [vmem:[#allocation2 + $0x50] sm:$0xff] %vm291_vm0, %v569_v59  ;;  %v1517_v3 = vpop.f32.mrb[12].mxu0  ;;  %v2121_v4 = vmul.f32 %v2112_v1, %v2112_v1  ;;  %v601_v59 = vld [vmem:[#allocation3 + $0x48] sm:$0xff] }
 0x10d   : > { %v572_v5 = vadd.f32 %v1517_v3, %v354_v61  ;;  %v540_v6 = vpop.f32.mrb[13].mxu0  ;;  %v914_v12 = vsel %vm291_vm0, %v2116_v2, 0.0  ;;  %850 = vst.msk [vmem:[#allocation3 + $0x40] sm:$0xff] %vm308_vm2, %v833_v56  ;;  %v1554_v3 = vpop.f32.mrb[10].mxu1  ;;  %v960_v56 = vld [vmem:[#allocation3 + $0x18] sm:$0xff] }
 0x10e   : > { %v571_v7 = vadd.f32 %v540_v6, %v353_v63  ;;  %909 = vadd.xlane.f32.xlu1 %v908_v0  ;;  %v911_v8 = vsel %vm291_vm0, %v2121_v4, 0.0  ;;  %v2125_v10 = vld [vmem:[#allocation2 + $0x48] sm:$0xff]  ;;  %v834_v0 = vadd.f32 %v1551_v48, %v601_v59  ;;  %v602_v6 = vld [vmem:[#allocation3 + $0x50] sm:$0xff]  ;;  %v992_v59 = vadd.f32 %v2208_v46, %v2052_v25 }
 0x10f   : > { %589 = vst.msk [vmem:[#allocation2 + $0x68] sm:$0xff] %vm291_vm0, %v572_v5  ;;  %912 = vadd.xlane.f32.xlu0 %v911_v8  ;;  %v2130_v13 = vld [vmem:[#allocation2 + $0x40] sm:$0xff]  ;;  %v2134_v14 = vmul.f32 %v2125_v10, %v2125_v10 }
 0x110   : > { %588 = vst.msk [vmem:[#allocation2 + $0x60] sm:$0xff] %vm291_vm0, %v571_v7  ;;  %v1520_v15 = vpop.f32.mrb[14].mxu0  ;;  %v2139_v16 = vmul.f32 %v2130_v13, %v2130_v13  ;;  %v796_v7 = vpop.f32.mrb[11].mxu1 }
 0x111   : > { %v574_v19 = vadd.f32 %v1520_v15, %v356_v9  ;;  %v550_v20 = vpop.f32.mrb[15].mxu0  ;;  %v920_v26 = vsel %vm291_vm0, %v2134_v14, 0.0  ;;  %851 = vst.msk [vmem:[#allocation3 + $0x48] sm:$0xff] %vm308_vm2, %v834_v0  ;;  %v835_v8 = vadd.f32 %v796_v7, %v602_v6  ;;  %v1557_v17 = vpop.f32.mrb[12].mxu1 }
 0x112   : > { %v573_v22 = vadd.f32 %v550_v20, %v355_v11  ;;  %915 = vadd.xlane.f32.xlu1 %v914_v12  ;;  %v917_v23 = vsel %vm291_vm0, %v2139_v16, 0.0  ;;  %v2143_v24 = vld [vmem:[#allocation2 + $0x58] sm:$0xff] }
 0x113   : > { %591 = vst.msk [vmem:[#allocation2 + $0x78] sm:$0xff] %vm291_vm0, %v574_v19  ;;  %918 = vadd.xlane.f32.xlu0 %v917_v23  ;;  %v2148_v29 = vld [vmem:[#allocation2 + $0x50] sm:$0xff]  ;;  %v2152_v30 = vmul.f32 %v2143_v24, %v2143_v24  ;;  %v603_v11 = vld [vmem:[#allocation3 + $0x58] sm:$0xff]  ;;  %v806_v19 = vpop.f32.mrb[13].mxu1 }
 0x114   : > { %590 = vst.msk [vmem:[#allocation2 + $0x70] sm:$0xff] %vm291_vm0, %v573_v22  ;;  %v2158_v32 = vmul.f32 %v2148_v29, %v2148_v29  ;;  %v836_v15 = vadd.f32 %v1554_v3, %v603_v11  ;;  %v837_v20 = vadd.f32 %v806_v19, %v604_v18  ;;  %v838_v22 = vadd.f32 %v1557_v17, %v605_v21  ;;  %v1560_v23 = vpop.f32.mrb[14].mxu1 }
 0x115   : > { %v926_v43 = vsel %vm291_vm0, %v2152_v30, 0.0  ;;  %852 = vst.msk [vmem:[#allocation3 + $0x50] sm:$0xff] %vm308_vm2, %v835_v8  ;;  %v816_v31 = vpop.f32.mrb[15].mxu1  ;;  %v840_v36 = vadd.f32 %v1560_v23, %v607_v34  ;;  %v993_v23 = vadd.f32 %v2208_v46, %v2078_v41 }
 0x116   : > { %921 = vadd.xlane.f32.xlu1 %v920_v26  ;;  %v923_v37 = vsel %vm291_vm0, %v2158_v32, 0.0  ;;  %v2162_v39 = vld [vmem:[#allocation2 + $0x68] sm:$0xff]  ;;  %853 = vst.msk [vmem:[#allocation3 + $0x58] sm:$0xff] %vm308_vm2, %v836_v15  ;;  %854 = vst.msk [vmem:[#allocation3 + $0x60] sm:$0xff] %vm308_vm2, %v837_v20  ;;  %v606_v26 = vld [vmem:[#allocation3 + $0x70] sm:$0xff] }
 0x117   : > { %924 = vadd.xlane.f32.xlu0 %v923_v37  ;;  %v2166_v44 = vld [vmem:[#allocation2 + $0x60] sm:$0xff]  ;;  %v2170_v45 = vmul.f32 %v2162_v39, %v2162_v39  ;;  %855 = vst.msk [vmem:[#allocation3 + $0x68] sm:$0xff] %vm308_vm2, %v838_v22  ;;  %v839_v33 = vadd.f32 %v816_v31, %v606_v26  ;;  %857 = vst.msk [vmem:[#allocation3 + $0x78] sm:$0xff] %vm308_vm2, %v840_v36  ;;  %v958_v37 = vld [vmem:[#allocation3 + $0x8] sm:$0xff] }
 0x118   : > { %v2175_v49 = vmul.f32 %v2166_v44, %v2166_v44  ;;  %v961_v15 = vld [vmem:[#allocation3 + $0x20] sm:$0xff]  ;;  %v963_v31 = vld [vmem:[#allocation3 + $0x30] sm:$0xff] }
 0x119   : > { %v932_v60 = vsel %vm291_vm0, %v2170_v45, 0.0  ;;  %856 = vst.msk [vmem:[#allocation3 + $0x70] sm:$0xff] %vm308_vm2, %v839_v33 }
 0x11a   : > { %927 = vadd.xlane.f32.xlu1 %v926_v43  ;;  %v929_v57 = vsel %vm291_vm0, %v2175_v49, 0.0  ;;  %v2180_v58 = vld [vmem:[#allocation2 + $0x78] sm:$0xff] }
 0x11b   : > { %930 = vadd.xlane.f32.xlu0 %v929_v57  ;;  %v2184_v61 = vld [vmem:[#allocation2 + $0x70] sm:$0xff]  ;;  %v2188_v63 = vmul.f32 %v2180_v58, %v2180_v58 }
 0x11c   : > { %v2193_v5 = vmul.f32 %v2184_v61, %v2184_v61 }
 0x11d   : > { %v938_v12 = vsel %vm291_vm0, %v2188_v63, 0.0 }
 0x11e   : > { %933 = vadd.xlane.f32.xlu1 %v932_v60  ;;  %v935_v9 = vsel %vm291_vm0, %v2193_v5, 0.0 }
 0x11f   : > { %936 = vadd.xlane.f32.xlu0 %v935_v9  ;;  %v959_v9 = vld [vmem:[#allocation3 + $0x10] sm:$0xff] }
 0x122   : > { %939 = vadd.xlane.f32.xlu1 %v938_v12  ;;  %v994_v12 = vadd.f32 %v2208_v46, %v2070_v38  ;;  %v962_v38 = vld [vmem:[#allocation3 + $0x28] sm:$0xff] }
 0x18f   : > { %v898_v42 = vpop.xlane.xlu0 %897 }
 0x190   : > { %v942_v43 = vsub.f32 %v898_v42, %v2058_v27  ;;  %v991_v27 = vadd.f32 %v2208_v46, %v2060_v28 }
 0x192   : > { %v974_v48 = vsub.f32 %v942_v43, %v958_v37 }
 0x193   : > { %v895_v54 = vpop.xlane.xlu0 %894  ;;  %v904_v57 = vpop.xlane.xlu1 %903 }
 0x194   : > { %v1008_v60 = vmul.f32 0.5, %v974_v48  ;;  %v941_v0 = vsub.f32 %v895_v54, %v2068_v35  ;;  %v944_v3 = vsub.f32 %v904_v57, %v2076_v40  ;;  %v964_v48 = vld [vmem:[#allocation3 + $0x38] sm:$0xff]  ;;  %v996_v54 = vadd.f32 %v2208_v46, %v2089_v50 }
 0x196   : > { %v1024_v6 = vadd.f32 %v1008_v60, %v992_v59  ;;  %v973_v7 = vsub.f32 %v941_v0, %v957_v51  ;;  %v976_v8 = vsub.f32 %v944_v3, %v960_v56 }
 0x197   : > { %v901_v11 = vpop.xlane.xlu1 %900 }
 0x198   : > { %1040 = vst.msk [vmem:[%s2218_s17 + $0x8] sm:$0xff] %vm308_vm2, %v1024_v6  ;;  %v1007_v25 = vmul.f32 0.5, %v973_v7  ;;  %v1010_v35 = vmul.f32 0.5, %v976_v8  ;;  %v943_v40 = vsub.f32 %v901_v11, %v2087_v47  ;;  %v907_v17 = vpop.xlane.xlu0 %906  ;;  %v966_v7 = vld [vmem:[#allocation3 + $0x48] sm:$0xff] }
 0x199   : > { %v945_v28 = vsub.f32 %v907_v17, %v2101_v55  ;;  %v995_v55 = vadd.f32 %v2208_v46, %v2092_v52  ;;  %v965_v52 = vld [vmem:[#allocation3 + $0x40] sm:$0xff]  ;;  %v968_v17 = vld [vmem:[#allocation3 + $0x58] sm:$0xff] }
 0x19a   : > { %v1023_v18 = vadd.f32 %v1007_v25, %v991_v27  ;;  %v1026_v19 = vadd.f32 %v1010_v35, %v994_v12  ;;  %v975_v20 = vsub.f32 %v943_v40, %v959_v9  ;;  %v967_v9 = vld [vmem:[#allocation3 + $0x50] sm:$0xff] }
 0x19b   : > { %v977_v21 = vsub.f32 %v945_v28, %v961_v15  ;;  %v910_v22 = vpop.xlane.xlu1 %909 }
 0x19c   : > { %1039 = vst.msk [vmem:[%s2218_s17] sm:$0xff] %vm308_vm2, %v1023_v18  ;;  %1042 = vst.msk [vmem:[%s2218_s17 + $0x18] sm:$0xff] %vm308_vm2, %v1026_v19  ;;  %v1009_v26 = vmul.f32 0.5, %v975_v20  ;;  %v946_v47 = vsub.f32 %v910_v22, %v2096_v53  ;;  %v913_v33 = vpop.xlane.xlu0 %912  ;;  %v969_v19 = vld [vmem:[#allocation3 + $0x60] sm:$0xff] }
 0x19d   : > { %v1011_v34 = vmul.f32 0.5, %v977_v21  ;;  %v947_v36 = vsub.f32 %v913_v33, %v2121_v4  ;;  %v997_v4 = vadd.f32 %v2208_v46, %v2112_v1 }
 0x19e   : > { %v1025_v37 = vadd.f32 %v1009_v26, %v993_v23  ;;  %v978_v42 = vsub.f32 %v946_v47, %v962_v38  ;;  %v970_v47 = vld [vmem:[#allocation3 + $0x68] sm:$0xff] }
 0x19f   : > { %v1027_v41 = vadd.f32 %v1011_v34, %v995_v55  ;;  %v979_v43 = vsub.f32 %v947_v36, %v963_v31  ;;  %v916_v51 = vpop.xlane.xlu1 %915  ;;  %v971_v55 = vld [vmem:[#allocation3 + $0x70] sm:$0xff] }
 0x1a0   : > { %1041 = vst.msk [vmem:[%s2218_s17 + $0x10] sm:$0xff] %vm308_vm2, %v1025_v37  ;;  %v1012_v53 = vmul.f32 0.5, %v978_v42  ;;  %v948_v56 = vsub.f32 %v916_v51, %v2116_v2  ;;  %v919_v57 = vpop.xlane.xlu0 %918  ;;  %v998_v2 = vadd.f32 %v2208_v46, %v2107_v62 }
 0x1a1   : > { %1043 = vst.msk [vmem:[%s2218_s17 + $0x20] sm:$0xff] %vm308_vm2, %v1027_v41  ;;  %v1013_v59 = vmul.f32 0.5, %v979_v43  ;;  %v949_v60 = vsub.f32 %v919_v57, %v2139_v16  ;;  %v999_v16 = vadd.f32 %v2208_v46, %v2130_v13 }
 0x1a2   : > { %v1028_v0 = vadd.f32 %v1012_v53, %v996_v54  ;;  %v980_v3 = vsub.f32 %v948_v56, %v964_v48  ;;  %v972_v48 = vld [vmem:[#allocation3 + $0x78] sm:$0xff] }
 0x1a3   : > { %v1029_v50 = vadd.f32 %v1013_v59, %v997_v4  ;;  %v981_v6 = vsub.f32 %v949_v60, %v965_v52  ;;  %v922_v8 = vpop.xlane.xlu1 %921  ;;  %v1006_v4 = vadd.f32 %v2208_v46, %v2180_v58 }
 0x1a4   : > { %1044 = vst.msk [vmem:[%s2218_s17 + $0x28] sm:$0xff] %vm308_vm2, %v1028_v0  ;;  %v1014_v27 = vmul.f32 0.5, %v980_v3  ;;  %v950_v1 = vsub.f32 %v922_v8, %v2134_v14  ;;  %v925_v11 = vpop.xlane.xlu0 %924  ;;  %v1000_v14 = vadd.f32 %v2208_v46, %v2125_v10 }
 0x1a5   : > { %1045 = vst.msk [vmem:[%s2218_s17 + $0x30] sm:$0xff] %vm308_vm2, %v1029_v50  ;;  %v1015_v12 = vmul.f32 0.5, %v981_v6  ;;  %v951_v25 = vsub.f32 %v925_v11, %v2158_v32  ;;  %v1001_v32 = vadd.f32 %v2208_v46, %v2148_v29 }
 0x1a6   : > { %v1030_v35 = vadd.f32 %v1014_v27, %v998_v2  ;;  %v982_v40 = vsub.f32 %v950_v1, %v966_v7 }
 0x1a7   : > { %v1031_v62 = vadd.f32 %v1015_v12, %v999_v16  ;;  %v983_v15 = vsub.f32 %v951_v25, %v967_v9  ;;  %v928_v28 = vpop.xlane.xlu1 %927 }
 0x1a8   : > { %1046 = vst.msk [vmem:[%s2218_s17 + $0x38] sm:$0xff] %vm308_vm2, %v1030_v35  ;;  %v1016_v18 = vmul.f32 0.5, %v982_v40  ;;  %v952_v13 = vsub.f32 %v928_v28, %v2152_v30  ;;  %v931_v20 = vpop.xlane.xlu0 %930  ;;  %v1002_v30 = vadd.f32 %v2208_v46, %v2143_v24 }
 0x1a9   : > { %1047 = vst.msk [vmem:[%s2218_s17 + $0x40] sm:$0xff] %vm308_vm2, %v1031_v62  ;;  %v1017_v21 = vmul.f32 0.5, %v983_v15  ;;  %v953_v38 = vsub.f32 %v931_v20, %v2175_v49  ;;  %v1003_v49 = vadd.f32 %v2208_v46, %v2166_v44 }
 0x1aa   : > { %v1032_v22 = vadd.f32 %v1016_v18, %v1000_v14  ;;  %v984_v23 = vsub.f32 %v952_v13, %v968_v17 }
 0x1ab   : > { %v1033_v10 = vadd.f32 %v1017_v21, %v1001_v32  ;;  %v985_v26 = vsub.f32 %v953_v38, %v969_v19  ;;  %v934_v31 = vpop.xlane.xlu1 %933 }
 0x1ac   : > { %1048 = vst.msk [vmem:[%s2218_s17 + $0x48] sm:$0xff] %vm308_vm2, %v1032_v22  ;;  %v1018_v33 = vmul.f32 0.5, %v984_v23  ;;  %v954_v29 = vsub.f32 %v934_v31, %v2170_v45  ;;  %v937_v34 = vpop.xlane.xlu0 %936  ;;  %v1004_v45 = vadd.f32 %v2208_v46, %v2162_v39 }
 0x1ad   : > { %1049 = vst.msk [vmem:[%s2218_s17 + $0x50] sm:$0xff] %vm308_vm2, %v1033_v10  ;;  %v1019_v36 = vmul.f32 0.5, %v985_v26  ;;  %v955_v37 = vsub.f32 %v937_v34, %v2193_v5  ;;  %v1005_v5 = vadd.f32 %v2208_v46, %v2184_v61 }
 0x1ae   : > { %v1034_v42 = vadd.f32 %v1018_v33, %v1002_v30  ;;  %v986_v41 = vsub.f32 %v954_v29, %v970_v47 }
 0x1af   : > { %v1035_v24 = vadd.f32 %v1019_v36, %v1003_v49  ;;  %v987_v43 = vsub.f32 %v955_v37, %v971_v55  ;;  %v940_v51 = vpop.xlane.xlu1 %939 }
 0x1b0   : > { %1050 = vst.msk [vmem:[%s2218_s17 + $0x58] sm:$0xff] %vm308_vm2, %v1034_v42  ;;  %v1020_v44 = vmul.f32 0.5, %v986_v41  ;;  %v956_v54 = vsub.f32 %v940_v51, %v2188_v63 }
 0x1b1   : > { %1051 = vst.msk [vmem:[%s2218_s17 + $0x60] sm:$0xff] %vm308_vm2, %v1035_v24  ;;  %v1021_v53 = vmul.f32 0.5, %v987_v43 }
 0x1b2   : > { %v1036_v56 = vadd.f32 %v1020_v44, %v1004_v45  ;;  %v988_v52 = vsub.f32 %v956_v54, %v972_v48  ;;  %1061 = sbr.rel (!%p1863_p3) target bundleno = 490 (0x1ea), region = 48 }
 0x1b3   : > { %v1037_v57 = vadd.f32 %v1021_v53, %v1005_v5 }
 0x1b4   : > { %1052 = vst.msk [vmem:[%s2218_s17 + $0x68] sm:$0xff] %vm308_vm2, %v1036_v56  ;;  %v1022_v39 = vmul.f32 0.5, %v988_v52 }
 0x1b5   : > { %1053 = vst.msk [vmem:[%s2218_s17 + $0x70] sm:$0xff] %vm308_vm2, %v1037_v57 }
 0x1b6   : > { %v1038_v59 = vadd.f32 %v1022_v39, %v1006_v4 }
 0x1b8   : > { %1054 = vst.msk [vmem:[%s2218_s17 + $0x78] sm:$0xff] %vm308_vm2, %v1038_v59 }
 0x1b9   : > { %s2412_s5 = smov (!%p1064_p9, %s1063_s5), 16 }
 0x1ba   : > { %s1415_s11 = sshll.u32 %s2412_s5, 7 }
 0x1bb   : > { %p1418_p10 = scmp.eq.s32.totalorder %s1415_s11, 0 }
 0x1bc   : > { %s2304_s12 = sshrl.u32 (!%p1418_p10), %s2412_s5, 4 }
 0x1bd   : > { %1072 = sbr.rel (%p1418_p10) target bundleno = 490 (0x1ea), region = 52  ;;  %p1419_p11 = scmp.le.s32.totalorder (!%p1418_p10), %s2304_s12, 0 }
 0x1c4   : > { %1301 = sbr.rel (%p1419_p11) target bundleno = 469 (0x1d5), region = 134  ;;  %s2402_s19 = smov (!%p1419_p11), %s2298_s10 }
 0x1c5   : > { %s2403_s24 = smov (!%p1419_p11), %s2218_s17  ;;  %s2313_s7 = smov (!%p1419_p11), 0  }
 0x1c6   : > { %s2315_s13 = smov (!%p1419_p11), 0  }
 0x1cb LB: >> { %v1164_v58 = vld [vmem:[%s1776_s24] sm:$0xff]  ;;  %v1166_v61 = vld [vmem:[%s1776_s24 + $0x8] sm:$0xff]  ;;  %v1168_v63 = vld [vmem:[%s1776_s24 + $0x10] sm:$0xff]  ;;  %s1196_s14 = sadd.s32 1, %s1780_s7  ;;  %s1158_s13 = sadd.s32 1, %s1784_s13   ;;  %s1784_s13 = sphi %s2315_s13, %s1158_s13   ;;  %s1780_s7 = sphi %s2313_s7, %s2404_s7   ;;  %s1776_s24 = sphi %s2403_s24, %s1201_s24   ;;  %s1772_s19 = sphi %s2402_s19, %s1202_s19  }
 0x1cc   : >> { %1165 = vst [vmem:[%s1772_s19] sm:$0xff] %v1164_v58  ;;  %1167 = vst [vmem:[%s1772_s19 + $0x8] sm:$0xff] %v1166_v61  ;;  %v1170_v46 = vld [vmem:[%s1776_s24 + $0x18] sm:$0xff]  ;;  %v1172_v60 = vld [vmem:[%s1776_s24 + $0x20] sm:$0xff]  ;;  %p1197_p12 = scmp.ge.s32.totalorder %s1196_s14, %s2304_s12  ;;  %p1157_p13 = scmp.ge.s32.totalorder %s1158_s13, %s2304_s12 }
 0x1cd   : >> { %1169 = vst [vmem:[%s1772_s19 + $0x10] sm:$0xff] %v1168_v63  ;;  %v1174_v0 = vld [vmem:[%s1776_s24 + $0x28] sm:$0xff]  ;;  %1171 = vst [vmem:[%s1772_s19 + $0x18] sm:$0xff] %v1170_v46  ;;  %v1176_v3 = vld [vmem:[%s1776_s24 + $0x30] sm:$0xff] }
 0x1ce   : >> { %1173 = vst [vmem:[%s1772_s19 + $0x20] sm:$0xff] %v1172_v60  ;;  %1175 = vst [vmem:[%s1772_s19 + $0x28] sm:$0xff] %v1174_v0  ;;  %v1178_v50 = vld [vmem:[%s1776_s24 + $0x38] sm:$0xff]  ;;  %v1180_v6 = vld [vmem:[%s1776_s24 + $0x40] sm:$0xff]  ;;  %s2414_s14 = smov (%p1197_p12, %s1196_s14), 0  ;;  %1160 = sbr.rel (!%p1157_p13) target bundleno = 459 (0x1cb), region = 140 }
 0x1cf   : >> { %1177 = vst [vmem:[%s1772_s19 + $0x30] sm:$0xff] %v1176_v3  ;;  %1179 = vst [vmem:[%s1772_s19 + $0x38] sm:$0xff] %v1178_v50  ;;  %v1182_v7 = vld [vmem:[%s1776_s24 + $0x48] sm:$0xff]  ;;  %v1184_v8 = vld [vmem:[%s1776_s24 + $0x50] sm:$0xff]  ;;  %s1420_s15 = sshll.u32 %s2414_s14, 7  ;;  %s2404_s7 = smov %s2414_s14 }
 0x1d0   : >> { %1181 = vst [vmem:[%s1772_s19 + $0x40] sm:$0xff] %v1180_v6  ;;  %v1186_v2 = vld [vmem:[%s1776_s24 + $0x58] sm:$0xff]  ;;  %1183 = vst [vmem:[%s1772_s19 + $0x48] sm:$0xff] %v1182_v7  ;;  %v1188_v27 = vld [vmem:[%s1776_s24 + $0x60] sm:$0xff] }
 0x1d1   : >> { %1185 = vst [vmem:[%s1772_s19 + $0x50] sm:$0xff] %v1184_v8  ;;  %1187 = vst [vmem:[%s1772_s19 + $0x58] sm:$0xff] %v1186_v2  ;;  %v1190_v1 = vld [vmem:[%s1776_s24 + $0x68] sm:$0xff]  ;;  %v1192_v9 = vld [vmem:[%s1776_s24 + $0x70] sm:$0xff] }
 0x1d2   : >> { %1189 = vst [vmem:[%s1772_s19 + $0x60] sm:$0xff] %v1188_v27  ;;  %1191 = vst [vmem:[%s1772_s19 + $0x68] sm:$0xff] %v1190_v1  ;;  %v1194_v11 = vld [vmem:[%s1776_s24 + $0x78] sm:$0xff]  ;;  %s1201_s24 = scalar_lea.vmem %s2218_s17, %s1420_s15 [#allocation5]  }
 0x1d3   : >> { %1193 = vst [vmem:[%s1772_s19 + $0x70] sm:$0xff] %v1192_v9  ;;  %1195 = vst [vmem:[%s1772_s19 + $0x78] sm:$0xff] %v1194_v11  ;;  %s1202_s19 = scalar_lea.vmem %s2298_s10, %s1420_s15  }
 0x1d5 PF: > { %s2373_s16 = sand.u32 15, %s2412_s5   ;;  %s1431_s0 = sshll.u32 %s2304_s12, 7 }
 0x1d6   : > { %s1207_s23 = scalar_lea.vmem %s2218_s17, %s1431_s0 [#allocation5]   ;;  %s1209_s25 = scalar_lea.vmem %s2298_s10, %s1431_s0  }
 0x1d7   : > { %p1425_p0 = scmp.le.s32.totalorder %s2373_s16, 0 }
 0x1d8   : > { %s1786_s27 = smov (!%p1425_p0), %s1209_s25   ;;  %s1790_s28 = smov (!%p1425_p0), %s1207_s23  }
 0x1d9   : > { %1315 = sbr.rel (%p1425_p0) target bundleno = 490 (0x1ea), region = 145  ;;  %s1794_s29 = smov (!%p1425_p0), 0  }
 0x1da   : > { %s1798_s30 = smov (!%p1425_p0), 0  }
 0x1e0 LB: >> { %v1219_v16 = vld [vmem:[%s1792_s28] sm:$0xff]  ;;  %s1221_s5 = sadd.s32 1, %s1796_s29  ;;  %s1213_s30 = sadd.s32 1, %s1800_s30   ;;  %s1800_s30 = sphi %s1798_s30, %s1213_s30   ;;  %s1796_s29 = sphi %s1794_s29, %s1795_s29   ;;  %s1792_s28 = sphi %s1790_s28, %s1226_s28   ;;  %s1788_s27 = sphi %s1786_s27, %s1227_s27  }
 0x1e1   : >> { %1220 = vst [vmem:[%s1788_s27] sm:$0xff] %v1219_v16  ;;  %p1222_p1 = scmp.ge.s32.totalorder %s1221_s5, %s2373_s16  ;;  %p1212_p2 = scmp.ge.s32.totalorder %s1213_s30, %s2373_s16 }
 0x1e3   : >> { %s2416_s5 = smov (%p1222_p1, %s1221_s5), 0  ;;  %1215 = sbr.rel (!%p1212_p2) target bundleno = 480 (0x1e0), region = 151 }
 0x1e4   : >> { %s1426_s17 = sshll.u32 %s2416_s5, 3  ;;  %s1795_s29 = smov %s2416_s5  }
 0x1e5   : >> { %s1226_s28 = scalar_lea.vmem %s1207_s23, %s1426_s17 [#allocation5]   ;;  %s1227_s27 = scalar_lea.vmem %s1209_s25, %s1426_s17  }
 0x1ea PF: > { %s15_s21 = sadd.s32 1, %s1768_s21   ;;  %s2405_s17 = smov %s1756_s18 }
 0x1eb   : > { %p12_p3 = scmp.ge.s32.totalorder %s15_s21, 5   ;;  %s2406_s18 = smov %s1872_s26 }
 0x1ec   : > { %s2407_s19 = smov %s1764_s20  ;;  %s2408_s20 = smov %s2410_s22 }
 0x1ed   :  { %14 = sbr.rel (!%p12_p3) target bundleno = 5 (0x5), region = 162 }

// kernel: tpu_custom_call.1
= control target key start
LH: loop header
LB: loop body
LE: loop exit
PB: predicated region body
PF: predicated region fallthrough
CT: control target
= control target key end

     0   :  { %s2396_s0 = inlined_call_operand.<no memory space> [shape: f32[1,1], index: 0, kind: input, shape index: {}]   ;;  %s2397_s1 = inlined_call_operand.vmem [shape: f32[300,64], index: 1, kind: input, shape index: {}]   ;;  %s2398_s2 = inlined_call_operand.vmem [shape: f32[64,17], index: 2, kind: input, shape index: {}]   ;;  %s2399_s3 = inlined_call_operand.vmem [shape: f32[64,1], index: 3, kind: input, shape index: {}]   ;;  %s2400_s4 = inlined_call_operand.vmem [shape: f32[300,1], index: 4, kind: output, shape index: {}]  }
   0x1   :  { %9 = sst [smem:[#allocation4]] %s2396_s0 }
   0x2   :  { %s1831_s17 = smov 0   ;;  %s1833_s18 = smov 0  }
   0x3   :  { %s1835_s19 = smov 0   ;;  %s1837_s20 = smov 0  }
   0x4   :  { %s1839_s21 = smov 0  }
   0x5 LB: > { %s1371_s0 = sadd.s32 4294967295, %s1768_s21   ;;  %s27_s22 = sadd.s32 1, %s1764_s20  ;;  %s1768_s21 = sphi %s1839_s21, %s15_s21   ;;  %s1764_s20 = sphi %s1837_s20, %s2408_s20   ;;  %s1760_s19 = sphi %s1835_s19, %s2407_s19   ;;  %s1756_s18 = sphi %s1833_s18, %s2406_s18   ;;  %s1752_s17 = sphi %s1831_s17, %s2405_s17  }
   0x6   : > { %p29_p0 = scmp.ge.s32.totalorder %s27_s22, 3  ;;  %s135_s23 = sadd.s32 1, %s1756_s18 }
   0x7   : > { %p145_p1 = scmp.ne.s32.totalorder %s1756_s18, %s1752_s17  ;;  %p146_p2 = scmp.eq.s32.totalorder %s1371_s0, 2 }
   0x8   : > { %s2410_s22 = smov (%p29_p0, %s27_s22), 0  ;;  %p1377_p4 = scmp.ge.s32.totalorder %s1768_s21, 1 }
   0x9   : > { %p1863_p3 = por %p146_p2, %p145_p1  ;;  %s132_s25 = ssub.s32 %s1764_s20, %s2410_s22 }
   0xa   : > { %p211_p5 = scmp.lt.s32.totalorder %s1768_s21, 4  ;;  %p133_p6 = scmp.eq.s32.totalorder %s132_s25, 0 }
   0xc   : > { %p212_p7 = pnand %p1377_p4, %p211_p5 }
   0xd   : > { %s1872_s26 = scalar_select %p133_p6, %s1756_s18, %s135_s23  }
   0xe   : > { %215 = sbr.rel (%p212_p7) target bundleno = 490 (0x1ea), region = 36  ;;  %v357_v0 = vld [vmem:[%s2398_s2] sm:$0xff] (!%p212_p7)  ;;  %v358_v1 = vld [vmem:[%s2398_s2 + $0x8] sm:$0xff] (!%p212_p7)  ;;  %v359_v2 = vld [vmem:[%s2398_s2 + $0x10] sm:$0xff] (!%p212_p7)  ;;  %s1884_s7 = sshll.u32 (!%p212_p7), %s1760_s19, 4  ;;  %vm291_vm0 = vcmask (!%p212_p7), 138240  }
   0xf   : > { %v1561_v3 = vpack.c.bf16 (!%p212_p7), %v358_v1, %v357_v0  ;;  %v360_v4 = vld [vmem:[%s2398_s2 + $0x18] sm:$0xff] (!%p212_p7)  ;;  %p258_p8 = scmp.lt.s32.totalorder (!%p212_p7), %s1884_s7, 37  ;;  %v361_v6 = vld [vmem:[%s2398_s2 + $0x20] sm:$0xff] (!%p212_p7)  ;;  %v362_v7 = vld [vmem:[%s2398_s2 + $0x28] sm:$0xff] (!%p212_p7)  ;;  %v1802_v9 = vmov (!%p212_p7), 0.0   ;;  %vm365_vm1 = vcmask (!%p212_p7), 523264  }
  0x10   : > { %v1565_v5 = vpack.c.bf16 (!%p212_p7), %v360_v4, %v359_v2  ;;  %v624_v8 = vld [vmem:[%s2399_s3] sm:$0xff] (!%p212_p7)  ;;  %293 = vst.msk [vmem:[#allocation2 + $0x8] sm:$0xff] (!%p212_p7), %vm291_vm0, %v1802_v9  ;;  %292 = vst.msk [vmem:[#allocation2] sm:$0xff] (!%p212_p7), %vm291_vm0, %v1802_v9  ;;  %v625_v10 = vld [vmem:[%s2399_s3 + $0x8] sm:$0xff] (!%p212_p7)  ;;  %v1569_v14 = vpack.c.bf16 (!%p212_p7), %v362_v7, %v361_v6  ;;  %vm308_vm2 = vcmask (!%p212_p7), 7168   ;;  %s989_s28 = sld [smem:[#allocation4]] (!%p212_p7) }
  0x11   : > { %294 = vst.msk [vmem:[#allocation2 + $0x10] sm:$0xff] (!%p212_p7), %vm291_vm0, %v1802_v9  ;;  %295 = vst.msk [vmem:[#allocation2 + $0x18] sm:$0xff] (!%p212_p7), %vm291_vm0, %v1802_v9  ;;  %1562 = vmatprep.subr.bf16.mxu0 (!%p212_p7), %v1561_v3  ;;  %v626_v11 = vld [vmem:[%s2399_s3 + $0x10] sm:$0xff] (!%p212_p7)  ;;  %v627_v12 = vld [vmem:[%s2399_s3 + $0x18] sm:$0xff] (!%p212_p7)  ;;  %v1577_v13 = vpack.c.bf16 (!%p212_p7), %v625_v10, %v624_v8  ;;  %s250_s29 = sand.u32 (!%p212_p7), 1, %s1752_s17  }
  0x12   : > { %296 = vst.msk [vmem:[#allocation2 + $0x20] sm:$0xff] (!%p212_p7), %vm291_vm0, %v1802_v9  ;;  %297 = vst.msk [vmem:[#allocation2 + $0x28] sm:$0xff] (!%p212_p7), %vm291_vm0, %v1802_v9  ;;  %1564 = vmatpush3.bf16.msra.mxu0 (!%p212_p7), %v1561_v3  ;;  %v1581_v15 = vpack.c.bf16 (!%p212_p7), %v627_v12, %v626_v11  ;;  %v628_v16 = vld [vmem:[%s2399_s3 + $0x20] sm:$0xff] (!%p212_p7)  ;;  %v629_v17 = vld [vmem:[%s2399_s3 + $0x28] sm:$0xff] (!%p212_p7) }
  0x13   : > { %298 = vst.msk [vmem:[#allocation2 + $0x30] sm:$0xff] (!%p212_p7), %vm291_vm0, %v1802_v9  ;;  %299 = vst.msk [vmem:[#allocation2 + $0x38] sm:$0xff] (!%p212_p7), %vm291_vm0, %v1802_v9  ;;  %1566 = vmatprep.subr.bf16.mxu0 (!%p212_p7), %v1565_v5  ;;  %v363_v18 = vld [vmem:[%s2398_s2 + $0x30] sm:$0xff] (!%p212_p7)  ;;  %v364_v19 = vld [vmem:[%s2398_s2 + $0x38] sm:$0xff] (!%p212_p7)  ;;  %1578 = vmatprep.subr.bf16.mxu1 (!%p212_p7), %v1577_v13  ;;  %v1585_v21 = vpack.c.bf16 (!%p212_p7), %v629_v17, %v628_v16 }
  0x14   : > { %300 = vst.msk [vmem:[#allocation2 + $0x40] sm:$0xff] (!%p212_p7), %vm291_vm0, %v1802_v9  ;;  %301 = vst.msk [vmem:[#allocation2 + $0x48] sm:$0xff] (!%p212_p7), %vm291_vm0, %v1802_v9  ;;  %1580 = vmatpush3.bf16.msra.mxu1 (!%p212_p7), %v1577_v13  ;;  %v1573_v23 = vpack.c.bf16 (!%p212_p7), %v364_v19, %v363_v18  ;;  %v630_v24 = vld [vmem:[%s2399_s3 + $0x30] sm:$0xff] (!%p212_p7)  ;;  %v631_v25 = vld [vmem:[%s2399_s3 + $0x38] sm:$0xff] (!%p212_p7) }
  0x15   : > { %302 = vst.msk [vmem:[#allocation2 + $0x50] sm:$0xff] %vm291_vm0, %v1802_v9  ;;  %303 = vst.msk [vmem:[#allocation2 + $0x58] sm:$0xff] %vm291_vm0, %v1802_v9  ;;  %s259_s16 = scalar_select %p258_p8, %s1884_s7, 37  ;;  %1582 = vmatprep.subr.bf16.mxu1 %v1581_v15  ;;  %v1589_v26 = vpack.c.bf16 %v631_v25, %v630_v24 }
  0x16   : > { %304 = vst.msk [vmem:[#allocation2 + $0x60] sm:$0xff] %vm291_vm0, %v1802_v9  ;;  %305 = vst.msk [vmem:[#allocation2 + $0x68] sm:$0xff] %vm291_vm0, %v1802_v9  ;;  %1568 = vmatpush3.bf16.msra.mxu0 %v1565_v5  ;;  %s1063_s5 = ssub.s32 (%p1863_p3), 38, %s1884_s7  ;;  %s1430_s6 = sshll.u32 (%p1863_p3), %s1760_s19, 7 }
  0x17   : > { %306 = vst.msk [vmem:[#allocation2 + $0x70] sm:$0xff] %vm291_vm0, %v1802_v9  ;;  %307 = vst.msk [vmem:[#allocation2 + $0x78] sm:$0xff] %vm291_vm0, %v1802_v9  ;;  %s1380_s30 = sshll.u32 %s259_s16, 3  ;;  %1570 = vmatprep.subr.bf16.mxu0 %v1569_v14  ;;  %v342_v57 = vld [vmem:[#allocation2 + $0x8] sm:$0xff]  ;;  %v341_v58 = vld [vmem:[#allocation2] sm:$0xff]  ;;  %p1064_p9 = scmp.lt.s32.totalorder (%p1863_p3), %s1063_s5, 16 }
  0x18   : > { %s1958_s16 = scalar_lea.vmem %s2397_s1, %s1380_s30  ;;  %1584 = vmatpush3.bf16.msra.mxu1 %v1581_v15  ;;  %310 = vst.msk [vmem:[#allocation3 + $0x8] sm:$0xff] %vm308_vm2, %v1802_v9  ;;  %309 = vst.msk [vmem:[#allocation3] sm:$0xff] %vm308_vm2, %v1802_v9  ;;  %v344_v0 = vld [vmem:[#allocation2 + $0x18] sm:$0xff]  ;;  %v343_v2 = vld [vmem:[#allocation2 + $0x10] sm:$0xff]  ;;  %s1378_s30 = sshll.u32 %s250_s29, 7 }
  0x19   : > { %v325_v20 = vld [vmem:[%s1958_s16] sm:$0xff]  ;;  %1586 = vmatprep.subr.bf16.mxu1 %v1585_v21  ;;  %v326_v27 = vld [vmem:[%s1958_s16 + $0x8] sm:$0xff]  ;;  %v327_v28 = vld [vmem:[%s1958_s16 + $0x10] sm:$0xff]  ;;  %311 = vst.msk [vmem:[#allocation3 + $0x10] sm:$0xff] %vm308_vm2, %v1802_v9  ;;  %s2218_s17 = scalar_lea.vmem [#allocation5], %s1378_s30   ;;  %s2298_s10 = scalar_lea.vmem (%p1863_p3), %s2400_s4, %s1430_s6  }
  0x1a   : > { %1497 = vmatprep.mubr.msk.f32.mxu0 %vm365_vm1, %v325_v20  ;;  %v608_v22 = vmul.f32 %v325_v20, %v325_v20  ;;  %1572 = vmatpush3.bf16.msra.mxu0 %v1569_v14  ;;  %v609_v29 = vmul.f32 %v326_v27, %v326_v27  ;;  %v610_v30 = vmul.f32 %v327_v28, %v327_v28  ;;  %v328_v31 = vld [vmem:[%s1958_s16 + $0x18] sm:$0xff]  ;;  %v329_v32 = vld [vmem:[%s1958_s16 + $0x20] sm:$0xff]  ;;  %v330_v35 = vld [vmem:[%s1958_s16 + $0x28] sm:$0xff] }
  0x1b   : > { %1574 = vmatprep.subr.bf16.mxu0 %v1573_v23  ;;  %v611_v33 = vmul.f32 %v328_v31, %v328_v31  ;;  %v612_v34 = vmul.f32 %v329_v32, %v329_v32  ;;  %v331_v36 = vld [vmem:[%s1958_s16 + $0x30] sm:$0xff]  ;;  %v613_v37 = vmul.f32 %v330_v35, %v330_v35  ;;  %v332_v39 = vld [vmem:[%s1958_s16 + $0x38] sm:$0xff]  ;;  %v333_v40 = vld [vmem:[%s1958_s16 + $0x40] sm:$0xff]  ;;  %312 = vst.msk [vmem:[#allocation3 + $0x18] sm:$0xff] %vm308_vm2, %v1802_v9 }
  0x1c   : > { %1537 = vmatprep.mubr.msk.f32.mxu1 %vm365_vm1, %v608_v22  ;;  %1588 = vmatpush3.bf16.msra.mxu1 %v1585_v21  ;;  %v614_v38 = vmul.f32 %v331_v36, %v331_v36  ;;  %v615_v41 = vmul.f32 %v332_v39, %v332_v39  ;;  %v616_v42 = vmul.f32 %v333_v40, %v333_v40  ;;  %v334_v43 = vld [vmem:[%s1958_s16 + $0x48] sm:$0xff]  ;;  %v335_v44 = vld [vmem:[%s1958_s16 + $0x50] sm:$0xff]  ;;  %v336_v47 = vld [vmem:[%s1958_s16 + $0x58] sm:$0xff] }
  0x1d   : > { %1590 = vmatprep.subr.bf16.mxu1 %v1589_v26  ;;  %v617_v45 = vmul.f32 %v334_v43, %v334_v43  ;;  %v618_v46 = vmul.f32 %v335_v44, %v335_v44  ;;  %v337_v48 = vld [vmem:[%s1958_s16 + $0x60] sm:$0xff]  ;;  %v619_v49 = vmul.f32 %v336_v47, %v336_v47  ;;  %v338_v51 = vld [vmem:[%s1958_s16 + $0x68] sm:$0xff]  ;;  %v339_v52 = vld [vmem:[%s1958_s16 + $0x70] sm:$0xff]  ;;  %313 = vst.msk [vmem:[#allocation3 + $0x20] sm:$0xff] %vm308_vm2, %v1802_v9 }
  0x1e   : > { %1576 = vmatpush3.bf16.msra.mxu0 %v1573_v23  ;;  %v620_v50 = vmul.f32 %v337_v48, %v337_v48  ;;  %v621_v53 = vmul.f32 %v338_v51, %v338_v51  ;;  %v622_v54 = vmul.f32 %v339_v52, %v339_v52  ;;  %v340_v55 = vld [vmem:[%s1958_s16 + $0x78] sm:$0xff]  ;;  %314 = vst.msk [vmem:[#allocation3 + $0x28] sm:$0xff] %vm308_vm2, %v1802_v9  ;;  %315 = vst.msk [vmem:[#allocation3 + $0x30] sm:$0xff] %vm308_vm2, %v1802_v9  ;;  %v346_v12 = vld [vmem:[#allocation2 + $0x28] sm:$0xff] }
  0x1f   : > { %v623_v56 = vmul.f32 %v340_v55, %v340_v55  ;;  %316 = vst.msk [vmem:[#allocation3 + $0x38] sm:$0xff] %vm308_vm2, %v1802_v9  ;;  %317 = vst.msk [vmem:[#allocation3 + $0x40] sm:$0xff] %vm308_vm2, %v1802_v9  ;;  %v593_v62 = vld [vmem:[#allocation3 + $0x8] sm:$0xff]  ;;  %v592_v1 = vld [vmem:[#allocation3] sm:$0xff] }
  0x20   : > { %1592 = vmatpush3.bf16.msra.mxu1 %v1589_v26  ;;  %318 = vst.msk [vmem:[#allocation3 + $0x48] sm:$0xff] %vm308_vm2, %v1802_v9  ;;  %319 = vst.msk [vmem:[#allocation3 + $0x50] sm:$0xff] %vm308_vm2, %v1802_v9  ;;  %v594_v13 = vld [vmem:[#allocation3 + $0x10] sm:$0xff]  ;;  %v345_v14 = vld [vmem:[#allocation2 + $0x20] sm:$0xff] }
  0x21   : > { %1498 = vmatmul.mubr.msk.f32.vlgmr.msra.gmra.mrb[0].mxu0 %vm365_vm1, %v326_v27  ;;  %320 = vst.msk [vmem:[#allocation3 + $0x58] sm:$0xff] %vm308_vm2, %v1802_v9  ;;  %321 = vst.msk [vmem:[#allocation3 + $0x60] sm:$0xff] %vm308_vm2, %v1802_v9  ;;  %v348_v24 = vld [vmem:[#allocation2 + $0x38] sm:$0xff]  ;;  %v347_v26 = vld [vmem:[#allocation2 + $0x30] sm:$0xff] }
  0x22   : > { %1500 = vmatprep.mubr.msk.f32.mxu0 %vm365_vm1, %v327_v28  ;;  %322 = vst.msk [vmem:[#allocation3 + $0x68] sm:$0xff] %vm308_vm2, %v1802_v9  ;;  %323 = vst.msk [vmem:[#allocation3 + $0x70] sm:$0xff] %vm308_vm2, %v1802_v9  ;;  %v595_v10 = vld [vmem:[#allocation3 + $0x18] sm:$0xff] }
  0x23   : > { %1538 = vmatmul.mubr.msk.f32.vlgmr.msra.gmra.mrb[0].mxu1 %vm365_vm1, %v609_v29  ;;  %324 = vst.msk [vmem:[#allocation3 + $0x78] sm:$0xff] %vm308_vm2, %v1802_v9 }
  0x24   : > { %1540 = vmatprep.mubr.msk.f32.mxu1 %vm365_vm1, %v610_v30 }
  0x25   : > { %1501 = vmatmul.mubr.msk.f32.gmra.mrb[2].mxu0 %vm365_vm1, %v328_v31  ;;  %v597_v22 = vld [vmem:[#allocation3 + $0x28] sm:$0xff] }
  0x26   : > { %1503 = vmatprep.mubr.msk.f32.mxu0 %vm365_vm1, %v329_v32 }
  0x27   : > { %1541 = vmatmul.mubr.msk.f32.gmra.mrb[2].mxu1 %vm365_vm1, %v611_v33 }
  0x28   : > { %1543 = vmatprep.mubr.msk.f32.mxu1 %vm365_vm1, %v612_v34 }
  0x29   : > { %1504 = vmatmul.mubr.msk.f32.gmra.mrb[4].mxu0 %vm365_vm1, %v330_v35 }
  0x2a   : > { %1506 = vmatprep.mubr.msk.f32.mxu0 %vm365_vm1, %v331_v36 }
  0x2b   : > { %1544 = vmatmul.mubr.msk.f32.gmra.mrb[4].mxu1 %vm365_vm1, %v613_v37  ;;  %v350_v37 = vld [vmem:[#allocation2 + $0x48] sm:$0xff] }
  0x2c   : > { %1546 = vmatprep.mubr.msk.f32.mxu1 %vm365_vm1, %v614_v38 }
  0x2d   : > { %1507 = vmatmul.mubr.msk.f32.gmra.mrb[6].mxu0 %vm365_vm1, %v332_v39  ;;  %v349_v39 = vld [vmem:[#allocation2 + $0x40] sm:$0xff] }
  0x2e   : > { %1509 = vmatprep.mubr.msk.f32.mxu0 %vm365_vm1, %v333_v40 }
  0x2f   : > { %1547 = vmatmul.mubr.msk.f32.gmra.mrb[6].mxu1 %vm365_vm1, %v615_v41 }
  0x30   : > { %1549 = vmatprep.mubr.msk.f32.mxu1 %vm365_vm1, %v616_v42 }
  0x31   : > { %1510 = vmatmul.mubr.msk.f32.gmra.mrb[8].mxu0 %vm365_vm1, %v334_v43 }
  0x32   : > { %1512 = vmatprep.mubr.msk.f32.mxu0 %vm365_vm1, %v335_v44 }
  0x33   : > { %1550 = vmatmul.mubr.msk.f32.gmra.mrb[8].mxu1 %vm365_vm1, %v617_v45 }
  0x34   : > { %1552 = vmatprep.mubr.msk.f32.mxu1 %vm365_vm1, %v618_v46 }
  0x35   : > { %1513 = vmatmul.mubr.msk.f32.gmra.mrb[10].mxu0 %vm365_vm1, %v336_v47 }
  0x36   : > { %1515 = vmatprep.mubr.msk.f32.mxu0 %vm365_vm1, %v337_v48 }
  0x37   : > { %1553 = vmatmul.mubr.msk.f32.gmra.mrb[10].mxu1 %vm365_vm1, %v619_v49  ;;  %v352_v49 = vld [vmem:[#allocation2 + $0x58] sm:$0xff] }
  0x38   : > { %1555 = vmatprep.mubr.msk.f32.mxu1 %vm365_vm1, %v620_v50 }
  0x39   : > { %1516 = vmatmul.mubr.msk.f32.gmra.mrb[12].mxu0 %vm365_vm1, %v338_v51  ;;  %v351_v51 = vld [vmem:[#allocation2 + $0x50] sm:$0xff] }
  0x3a   : > { %1518 = vmatprep.mubr.msk.f32.mxu0 %vm365_vm1, %v339_v52 }
  0x3b   : > { %1556 = vmatmul.mubr.msk.f32.gmra.mrb[12].mxu1 %vm365_vm1, %v621_v53 }
  0x3c   : > { %1558 = vmatprep.mubr.msk.f32.mxu1 %vm365_vm1, %v622_v54 }
  0x3d   : > { %1519 = vmatmul.mubr.msk.f32.gmra.mrb[14].mxu0 %vm365_vm1, %v340_v55 }
  0x3f   : > { %1559 = vmatmul.mubr.msk.f32.gmra.mrb[14].mxu1 %vm365_vm1, %v623_v56 }
  0xf4   : > { %v1499_v59 = vpop.f32.mrb[0].mxu0 }
  0xf5   : > { %v560_v60 = vadd.f32 %v1499_v59, %v342_v57  ;;  %v480_v61 = vpop.f32.mrb[1].mxu0 }
  0xf6   : > { %v559_v63 = vadd.f32 %v480_v61, %v341_v58  ;;  %v1539_v3 = vpop.f32.mrb[0].mxu1  ;;  %v354_v61 = vld [vmem:[#allocation2 + $0x68] sm:$0xff] }
  0xf7   : > { %577 = vst.msk [vmem:[#allocation2 + $0x8] sm:$0xff] %vm291_vm0, %v560_v60  ;;  %v826_v5 = vadd.f32 %v1539_v3, %v593_v62  ;;  %v746_v6 = vpop.f32.mrb[1].mxu1 }
  0xf8   : > { %576 = vst.msk [vmem:[#allocation2] sm:$0xff] %vm291_vm0, %v559_v63  ;;  %v1502_v4 = vpop.f32.mrb[2].mxu0  ;;  %v825_v9 = vadd.f32 %v746_v6, %v592_v1  ;;  %v353_v63 = vld [vmem:[#allocation2 + $0x60] sm:$0xff] }
  0xf9   : > { %v562_v7 = vadd.f32 %v1502_v4, %v344_v0  ;;  %v490_v8 = vpop.f32.mrb[3].mxu0  ;;  %843 = vst.msk [vmem:[#allocation3 + $0x8] sm:$0xff] %vm308_vm2, %v826_v5 }
  0xfa   : > { %v561_v11 = vadd.f32 %v490_v8, %v343_v2  ;;  %842 = vst.msk [vmem:[#allocation3] sm:$0xff] %vm308_vm2, %v825_v9  ;;  %v1542_v15 = vpop.f32.mrb[2].mxu1  ;;  %v356_v9 = vld [vmem:[#allocation2 + $0x78] sm:$0xff] }
  0xfb   : > { %579 = vst.msk [vmem:[#allocation2 + $0x18] sm:$0xff] %vm291_vm0, %v562_v7  ;;  %v828_v17 = vadd.f32 %v1542_v15, %v595_v10  ;;  %v756_v18 = vpop.f32.mrb[3].mxu1 }
  0xfc   : > { %578 = vst.msk [vmem:[#allocation2 + $0x10] sm:$0xff] %vm291_vm0, %v561_v11  ;;  %v1505_v16 = vpop.f32.mrb[4].mxu0  ;;  %v827_v21 = vadd.f32 %v756_v18, %v594_v13  ;;  %v355_v11 = vld [vmem:[#allocation2 + $0x70] sm:$0xff] }
  0xfd   : > { %v564_v19 = vadd.f32 %v1505_v16, %v346_v12  ;;  %v500_v20 = vpop.f32.mrb[5].mxu0  ;;  %845 = vst.msk [vmem:[#allocation3 + $0x18] sm:$0xff] %vm308_vm2, %v828_v17  ;;  %v596_v17 = vld [vmem:[#allocation3 + $0x20] sm:$0xff] }
  0xfe   : > { %v563_v23 = vadd.f32 %v500_v20, %v345_v14  ;;  %v2052_v25 = vld [vmem:[#allocation2 + $0x8] sm:$0xff]  ;;  %844 = vst.msk [vmem:[#allocation3 + $0x10] sm:$0xff] %vm308_vm2, %v827_v21  ;;  %v1545_v29 = vpop.f32.mrb[4].mxu1 }
  0xff   : > { %581 = vst.msk [vmem:[#allocation2 + $0x28] sm:$0xff] %vm291_vm0, %v564_v19  ;;  %v2058_v27 = vmul.f32 %v2052_v25, %v2052_v25  ;;  %v2060_v28 = vld [vmem:[#allocation2] sm:$0xff]  ;;  %v830_v31 = vadd.f32 %v1545_v29, %v597_v22  ;;  %v766_v18 = vpop.f32.mrb[5].mxu1 }
 0x100   : > { %580 = vst.msk [vmem:[#allocation2 + $0x20] sm:$0xff] %vm291_vm0, %v563_v23  ;;  %v1508_v30 = vpop.f32.mrb[6].mxu0  ;;  %v2068_v35 = vmul.f32 %v2060_v28, %v2060_v28  ;;  %v829_v21 = vadd.f32 %v766_v18, %v596_v17  ;;  %v604_v18 = vld [vmem:[#allocation3 + $0x60] sm:$0xff] }
 0x101   : > { %v566_v32 = vadd.f32 %v1508_v30, %v348_v24  ;;  %v510_v33 = vpop.f32.mrb[7].mxu0  ;;  %v896_v34 = vsel %vm291_vm0, %v2058_v27, 0.0  ;;  %847 = vst.msk [vmem:[#allocation3 + $0x28] sm:$0xff] %vm308_vm2, %v830_v31 }
 0x102   : > { %v565_v36 = vadd.f32 %v510_v33, %v347_v26  ;;  %897 = vadd.xlane.f32.xlu0 %v896_v34  ;;  %v2070_v38 = vld [vmem:[#allocation2 + $0x18] sm:$0xff]  ;;  %v893_v45 = vsel %vm291_vm0, %v2068_v35, 0.0  ;;  %846 = vst.msk [vmem:[#allocation3 + $0x20] sm:$0xff] %vm308_vm2, %v829_v21  ;;  %v1548_v31 = vpop.f32.mrb[6].mxu1  ;;  %v598_v33 = vld [vmem:[#allocation3 + $0x30] sm:$0xff]  ;;  %v605_v21 = vld [vmem:[#allocation3 + $0x68] sm:$0xff] }
 0x103   : > { %583 = vst.msk [vmem:[#allocation2 + $0x38] sm:$0xff] %vm291_vm0, %v566_v32  ;;  %v2076_v40 = vmul.f32 %v2070_v38, %v2070_v38  ;;  %v2078_v41 = vld [vmem:[#allocation2 + $0x10] sm:$0xff]  ;;  %v776_v34 = vpop.f32.mrb[7].mxu1 }
 0x104   : > { %582 = vst.msk [vmem:[#allocation2 + $0x30] sm:$0xff] %vm291_vm0, %v565_v36  ;;  %v1511_v42 = vpop.f32.mrb[8].mxu0  ;;  %v2087_v47 = vmul.f32 %v2078_v41, %v2078_v41  ;;  %v831_v36 = vadd.f32 %v776_v34, %v598_v33  ;;  %v607_v34 = vld [vmem:[#allocation3 + $0x78] sm:$0xff] }
 0x105   : > { %v568_v43 = vadd.f32 %v1511_v42, %v350_v37  ;;  %v520_v44 = vpop.f32.mrb[9].mxu0  ;;  %v902_v46 = vsel %vm291_vm0, %v2076_v40, 0.0  ;;  %v599_v42 = vld [vmem:[#allocation3 + $0x38] sm:$0xff] }
 0x106   : > { %v567_v48 = vadd.f32 %v520_v44, %v349_v39  ;;  %894 = vadd.xlane.f32.xlu0 %v893_v45  ;;  %903 = vadd.xlane.f32.xlu1 %v902_v46  ;;  %v2089_v50 = vld [vmem:[#allocation2 + $0x28] sm:$0xff]  ;;  %v899_v58 = vsel %vm291_vm0, %v2087_v47, 0.0  ;;  %v832_v46 = vadd.f32 %v1548_v31, %v599_v42  ;;  %848 = vst.msk [vmem:[#allocation3 + $0x30] sm:$0xff] %vm308_vm2, %v831_v36 }
 0x107   : > { %585 = vst.msk [vmem:[#allocation2 + $0x48] sm:$0xff] %vm291_vm0, %v568_v43  ;;  %v2092_v52 = vld [vmem:[#allocation2 + $0x20] sm:$0xff]  ;;  %v2096_v53 = vmul.f32 %v2089_v50, %v2089_v50 }
 0x108   : > { %584 = vst.msk [vmem:[#allocation2 + $0x40] sm:$0xff] %vm291_vm0, %v567_v48  ;;  %v1514_v54 = vpop.f32.mrb[10].mxu0  ;;  %v2101_v55 = vmul.f32 %v2092_v52, %v2092_v52  ;;  %v1551_v48 = vpop.f32.mrb[8].mxu1 }
 0x109   : > { %v570_v56 = vadd.f32 %v1514_v54, %v352_v49  ;;  %v530_v57 = vpop.f32.mrb[11].mxu0  ;;  %v908_v0 = vsel %vm291_vm0, %v2096_v53, 0.0  ;;  %v786_v54 = vpop.f32.mrb[9].mxu1  ;;  %849 = vst.msk [vmem:[#allocation3 + $0x38] sm:$0xff] %vm308_vm2, %v832_v46  ;;  %v2208_v46 = vstv %s989_s28 }
 0x10a   : > { %v569_v59 = vadd.f32 %v530_v57, %v351_v51  ;;  %900 = vadd.xlane.f32.xlu1 %v899_v58  ;;  %v905_v60 = vsel %vm291_vm0, %v2101_v55, 0.0  ;;  %v2107_v62 = vld [vmem:[#allocation2 + $0x38] sm:$0xff]  ;;  %v600_v51 = vld [vmem:[#allocation3 + $0x40] sm:$0xff] }
 0x10b   : > { %587 = vst.msk [vmem:[#allocation2 + $0x58] sm:$0xff] %vm291_vm0, %v570_v56  ;;  %906 = vadd.xlane.f32.xlu0 %v905_v60  ;;  %v2112_v1 = vld [vmem:[#allocation2 + $0x30] sm:$0xff]  ;;  %v2116_v2 = vmul.f32 %v2107_v62, %v2107_v62  ;;  %v833_v56 = vadd.f32 %v786_v54, %v600_v51  ;;  %v957_v51 = vld [vmem:[#allocation3] sm:$0xff] }
 0x10c   : > { %586 = vst.msk [vmem:[#allocation2 + $0x50] sm:$0xff] %vm291_vm0, %v569_v59  ;;  %v1517_v3 = vpop.f32.mrb[12].mxu0  ;;  %v2121_v4 = vmul.f32 %v2112_v1, %v2112_v1  ;;  %v601_v59 = vld [vmem:[#allocation3 + $0x48] sm:$0xff] }
 0x10d   : > { %v572_v5 = vadd.f32 %v1517_v3, %v354_v61  ;;  %v540_v6 = vpop.f32.mrb[13].mxu0  ;;  %v914_v12 = vsel %vm291_vm0, %v2116_v2, 0.0  ;;  %850 = vst.msk [vmem:[#allocation3 + $0x40] sm:$0xff] %vm308_vm2, %v833_v56  ;;  %v1554_v3 = vpop.f32.mrb[10].mxu1  ;;  %v960_v56 = vld [vmem:[#allocation3 + $0x18] sm:$0xff] }
 0x10e   : > { %v571_v7 = vadd.f32 %v540_v6, %v353_v63  ;;  %909 = vadd.xlane.f32.xlu1 %v908_v0  ;;  %v911_v8 = vsel %vm291_vm0, %v2121_v4, 0.0  ;;  %v2125_v10 = vld [vmem:[#allocation2 + $0x48] sm:$0xff]  ;;  %v834_v0 = vadd.f32 %v1551_v48, %v601_v59  ;;  %v602_v6 = vld [vmem:[#allocation3 + $0x50] sm:$0xff]  ;;  %v992_v59 = vadd.f32 %v2208_v46, %v2052_v25 }
 0x10f   : > { %589 = vst.msk [vmem:[#allocation2 + $0x68] sm:$0xff] %vm291_vm0, %v572_v5  ;;  %912 = vadd.xlane.f32.xlu0 %v911_v8  ;;  %v2130_v13 = vld [vmem:[#allocation2 + $0x40] sm:$0xff]  ;;  %v2134_v14 = vmul.f32 %v2125_v10, %v2125_v10 }
 0x110   : > { %588 = vst.msk [vmem:[#allocation2 + $0x60] sm:$0xff] %vm291_vm0, %v571_v7  ;;  %v1520_v15 = vpop.f32.mrb[14].mxu0  ;;  %v2139_v16 = vmul.f32 %v2130_v13, %v2130_v13  ;;  %v796_v7 = vpop.f32.mrb[11].mxu1 }
 0x111   : > { %v574_v19 = vadd.f32 %v1520_v15, %v356_v9  ;;  %v550_v20 = vpop.f32.mrb[15].mxu0  ;;  %v920_v26 = vsel %vm291_vm0, %v2134_v14, 0.0  ;;  %851 = vst.msk [vmem:[#allocation3 + $0x48] sm:$0xff] %vm308_vm2, %v834_v0  ;;  %v835_v8 = vadd.f32 %v796_v7, %v602_v6  ;;  %v1557_v17 = vpop.f32.mrb[12].mxu1 }
 0x112   : > { %v573_v22 = vadd.f32 %v550_v20, %v355_v11  ;;  %915 = vadd.xlane.f32.xlu1 %v914_v12  ;;  %v917_v23 = vsel %vm291_vm0, %v2139_v16, 0.0  ;;  %v2143_v24 = vld [vmem:[#allocation2 + $0x58] sm:$0xff] }
 0x113   : > { %591 = vst.msk [vmem:[#allocation2 + $0x78] sm:$0xff] %vm291_vm0, %v574_v19  ;;  %918 = vadd.xlane.f32.xlu0 %v917_v23  ;;  %v2148_v29 = vld [vmem:[#allocation2 + $0x50] sm:$0xff]  ;;  %v2152_v30 = vmul.f32 %v2143_v24, %v2143_v24  ;;  %v603_v11 = vld [vmem:[#allocation3 + $0x58] sm:$0xff]  ;;  %v806_v19 = vpop.f32.mrb[13].mxu1 }
 0x114   : > { %590 = vst.msk [vmem:[#allocation2 + $0x70] sm:$0xff] %vm291_vm0, %v573_v22  ;;  %v2158_v32 = vmul.f32 %v2148_v29, %v2148_v29  ;;  %v836_v15 = vadd.f32 %v1554_v3, %v603_v11  ;;  %v837_v20 = vadd.f32 %v806_v19, %v604_v18  ;;  %v838_v22 = vadd.f32 %v1557_v17, %v605_v21  ;;  %v1560_v23 = vpop.f32.mrb[14].mxu1 }
 0x115   : > { %v926_v43 = vsel %vm291_vm0, %v2152_v30, 0.0  ;;  %852 = vst.msk [vmem:[#allocation3 + $0x50] sm:$0xff] %vm308_vm2, %v835_v8  ;;  %v816_v31 = vpop.f32.mrb[15].mxu1  ;;  %v840_v36 = vadd.f32 %v1560_v23, %v607_v34  ;;  %v993_v23 = vadd.f32 %v2208_v46, %v2078_v41 }
 0x116   : > { %921 = vadd.xlane.f32.xlu1 %v920_v26  ;;  %v923_v37 = vsel %vm291_vm0, %v2158_v32, 0.0  ;;  %v2162_v39 = vld [vmem:[#allocation2 + $0x68] sm:$0xff]  ;;  %853 = vst.msk [vmem:[#allocation3 + $0x58] sm:$0xff] %vm308_vm2, %v836_v15  ;;  %854 = vst.msk [vmem:[#allocation3 + $0x60] sm:$0xff] %vm308_vm2, %v837_v20  ;;  %v606_v26 = vld [vmem:[#allocation3 + $0x70] sm:$0xff] }
 0x117   : > { %924 = vadd.xlane.f32.xlu0 %v923_v37  ;;  %v2166_v44 = vld [vmem:[#allocation2 + $0x60] sm:$0xff]  ;;  %v2170_v45 = vmul.f32 %v2162_v39, %v2162_v39  ;;  %855 = vst.msk [vmem:[#allocation3 + $0x68] sm:$0xff] %vm308_vm2, %v838_v22  ;;  %v839_v33 = vadd.f32 %v816_v31, %v606_v26  ;;  %857 = vst.msk [vmem:[#allocation3 + $0x78] sm:$0xff] %vm308_vm2, %v840_v36  ;;  %v958_v37 = vld [vmem:[#allocation3 + $0x8] sm:$0xff] }
 0x118   : > { %v2175_v49 = vmul.f32 %v2166_v44, %v2166_v44  ;;  %v961_v15 = vld [vmem:[#allocation3 + $0x20] sm:$0xff]  ;;  %v963_v31 = vld [vmem:[#allocation3 + $0x30] sm:$0xff] }
 0x119   : > { %v932_v60 = vsel %vm291_vm0, %v2170_v45, 0.0  ;;  %856 = vst.msk [vmem:[#allocation3 + $0x70] sm:$0xff] %vm308_vm2, %v839_v33 }
 0x11a   : > { %927 = vadd.xlane.f32.xlu1 %v926_v43  ;;  %v929_v57 = vsel %vm291_vm0, %v2175_v49, 0.0  ;;  %v2180_v58 = vld [vmem:[#allocation2 + $0x78] sm:$0xff] }
 0x11b   : > { %930 = vadd.xlane.f32.xlu0 %v929_v57  ;;  %v2184_v61 = vld [vmem:[#allocation2 + $0x70] sm:$0xff]  ;;  %v2188_v63 = vmul.f32 %v2180_v58, %v2180_v58 }
 0x11c   : > { %v2193_v5 = vmul.f32 %v2184_v61, %v2184_v61 }
 0x11d   : > { %v938_v12 = vsel %vm291_vm0, %v2188_v63, 0.0 }
 0x11e   : > { %933 = vadd.xlane.f32.xlu1 %v932_v60  ;;  %v935_v9 = vsel %vm291_vm0, %v2193_v5, 0.0 }
 0x11f   : > { %936 = vadd.xlane.f32.xlu0 %v935_v9  ;;  %v959_v9 = vld [vmem:[#allocation3 + $0x10] sm:$0xff] }
 0x122   : > { %939 = vadd.xlane.f32.xlu1 %v938_v12  ;;  %v994_v12 = vadd.f32 %v2208_v46, %v2070_v38  ;;  %v962_v38 = vld [vmem:[#allocation3 + $0x28] sm:$0xff] }
 0x18f   : > { %v898_v42 = vpop.xlane.xlu0 %897 }
 0x190   : > { %v942_v43 = vsub.f32 %v898_v42, %v2058_v27  ;;  %v991_v27 = vadd.f32 %v2208_v46, %v2060_v28 }
 0x192   : > { %v974_v48 = vsub.f32 %v942_v43, %v958_v37 }
 0x193   : > { %v895_v54 = vpop.xlane.xlu0 %894  ;;  %v904_v57 = vpop.xlane.xlu1 %903 }
 0x194   : > { %v1008_v60 = vmul.f32 0.5, %v974_v48  ;;  %v941_v0 = vsub.f32 %v895_v54, %v2068_v35  ;;  %v944_v3 = vsub.f32 %v904_v57, %v2076_v40  ;;  %v964_v48 = vld [vmem:[#allocation3 + $0x38] sm:$0xff]  ;;  %v996_v54 = vadd.f32 %v2208_v46, %v2089_v50 }
 0x196   : > { %v1024_v6 = vadd.f32 %v1008_v60, %v992_v59  ;;  %v973_v7 = vsub.f32 %v941_v0, %v957_v51  ;;  %v976_v8 = vsub.f32 %v944_v3, %v960_v56 }
 0x197   : > { %v901_v11 = vpop.xlane.xlu1 %900 }
 0x198   : > { %1040 = vst.msk [vmem:[%s2218_s17 + $0x8] sm:$0xff] %vm308_vm2, %v1024_v6  ;;  %v1007_v25 = vmul.f32 0.5, %v973_v7  ;;  %v1010_v35 = vmul.f32 0.5, %v976_v8  ;;  %v943_v40 = vsub.f32 %v901_v11, %v2087_v47  ;;  %v907_v17 = vpop.xlane.xlu0 %906  ;;  %v966_v7 = vld [vmem:[#allocation3 + $0x48] sm:$0xff] }
 0x199   : > { %v945_v28 = vsub.f32 %v907_v17, %v2101_v55  ;;  %v995_v55 = vadd.f32 %v2208_v46, %v2092_v52  ;;  %v965_v52 = vld [vmem:[#allocation3 + $0x40] sm:$0xff]  ;;  %v968_v17 = vld [vmem:[#allocation3 + $0x58] sm:$0xff] }
 0x19a   : > { %v1023_v18 = vadd.f32 %v1007_v25, %v991_v27  ;;  %v1026_v19 = vadd.f32 %v1010_v35, %v994_v12  ;;  %v975_v20 = vsub.f32 %v943_v40, %v959_v9  ;;  %v967_v9 = vld [vmem:[#allocation3 + $0x50] sm:$0xff] }
 0x19b   : > { %v977_v21 = vsub.f32 %v945_v28, %v961_v15  ;;  %v910_v22 = vpop.xlane.xlu1 %909 }
 0x19c   : > { %1039 = vst.msk [vmem:[%s2218_s17] sm:$0xff] %vm308_vm2, %v1023_v18  ;;  %1042 = vst.msk [vmem:[%s2218_s17 + $0x18] sm:$0xff] %vm308_vm2, %v1026_v19  ;;  %v1009_v26 = vmul.f32 0.5, %v975_v20  ;;  %v946_v47 = vsub.f32 %v910_v22, %v2096_v53  ;;  %v913_v33 = vpop.xlane.xlu0 %912  ;;  %v969_v19 = vld [vmem:[#allocation3 + $0x60] sm:$0xff] }
 0x19d   : > { %v1011_v34 = vmul.f32 0.5, %v977_v21  ;;  %v947_v36 = vsub.f32 %v913_v33, %v2121_v4  ;;  %v997_v4 = vadd.f32 %v2208_v46, %v2112_v1 }
 0x19e   : > { %v1025_v37 = vadd.f32 %v1009_v26, %v993_v23  ;;  %v978_v42 = vsub.f32 %v946_v47, %v962_v38  ;;  %v970_v47 = vld [vmem:[#allocation3 + $0x68] sm:$0xff] }
 0x19f   : > { %v1027_v41 = vadd.f32 %v1011_v34, %v995_v55  ;;  %v979_v43 = vsub.f32 %v947_v36, %v963_v31  ;;  %v916_v51 = vpop.xlane.xlu1 %915  ;;  %v971_v55 = vld [vmem:[#allocation3 + $0x70] sm:$0xff] }
 0x1a0   : > { %1041 = vst.msk [vmem:[%s2218_s17 + $0x10] sm:$0xff] %vm308_vm2, %v1025_v37  ;;  %v1012_v53 = vmul.f32 0.5, %v978_v42  ;;  %v948_v56 = vsub.f32 %v916_v51, %v2116_v2  ;;  %v919_v57 = vpop.xlane.xlu0 %918  ;;  %v998_v2 = vadd.f32 %v2208_v46, %v2107_v62 }
 0x1a1   : > { %1043 = vst.msk [vmem:[%s2218_s17 + $0x20] sm:$0xff] %vm308_vm2, %v1027_v41  ;;  %v1013_v59 = vmul.f32 0.5, %v979_v43  ;;  %v949_v60 = vsub.f32 %v919_v57, %v2139_v16  ;;  %v999_v16 = vadd.f32 %v2208_v46, %v2130_v13 }
 0x1a2   : > { %v1028_v0 = vadd.f32 %v1012_v53, %v996_v54  ;;  %v980_v3 = vsub.f32 %v948_v56, %v964_v48  ;;  %v972_v48 = vld [vmem:[#allocation3 + $0x78] sm:$0xff] }
 0x1a3   : > { %v1029_v50 = vadd.f32 %v1013_v59, %v997_v4  ;;  %v981_v6 = vsub.f32 %v949_v60, %v965_v52  ;;  %v922_v8 = vpop.xlane.xlu1 %921  ;;  %v1006_v4 = vadd.f32 %v2208_v46, %v2180_v58 }
 0x1a4   : > { %1044 = vst.msk [vmem:[%s2218_s17 + $0x28] sm:$0xff] %vm308_vm2, %v1028_v0  ;;  %v1014_v27 = vmul.f32 0.5, %v980_v3  ;;  %v950_v1 = vsub.f32 %v922_v8, %v2134_v14  ;;  %v925_v11 = vpop.xlane.xlu0 %924  ;;  %v1000_v14 = vadd.f32 %v2208_v46, %v2125_v10 }
 0x1a5   : > { %1045 = vst.msk [vmem:[%s2218_s17 + $0x30] sm:$0xff] %vm308_vm2, %v1029_v50  ;;  %v1015_v12 = vmul.f32 0.5, %v981_v6  ;;  %v951_v25 = vsub.f32 %v925_v11, %v2158_v32  ;;  %v1001_v32 = vadd.f32 %v2208_v46, %v2148_v29 }
 0x1a6   : > { %v1030_v35 = vadd.f32 %v1014_v27, %v998_v2  ;;  %v982_v40 = vsub.f32 %v950_v1, %v966_v7 }
 0x1a7   : > { %v1031_v62 = vadd.f32 %v1015_v12, %v999_v16  ;;  %v983_v15 = vsub.f32 %v951_v25, %v967_v9  ;;  %v928_v28 = vpop.xlane.xlu1 %927 }
 0x1a8   : > { %1046 = vst.msk [vmem:[%s2218_s17 + $0x38] sm:$0xff] %vm308_vm2, %v1030_v35  ;;  %v1016_v18 = vmul.f32 0.5, %v982_v40  ;;  %v952_v13 = vsub.f32 %v928_v28, %v2152_v30  ;;  %v931_v20 = vpop.xlane.xlu0 %930  ;;  %v1002_v30 = vadd.f32 %v2208_v46, %v2143_v24 }
 0x1a9   : > { %1047 = vst.msk [vmem:[%s2218_s17 + $0x40] sm:$0xff] %vm308_vm2, %v1031_v62  ;;  %v1017_v21 = vmul.f32 0.5, %v983_v15  ;;  %v953_v38 = vsub.f32 %v931_v20, %v2175_v49  ;;  %v1003_v49 = vadd.f32 %v2208_v46, %v2166_v44 }
 0x1aa   : > { %v1032_v22 = vadd.f32 %v1016_v18, %v1000_v14  ;;  %v984_v23 = vsub.f32 %v952_v13, %v968_v17 }
 0x1ab   : > { %v1033_v10 = vadd.f32 %v1017_v21, %v1001_v32  ;;  %v985_v26 = vsub.f32 %v953_v38, %v969_v19  ;;  %v934_v31 = vpop.xlane.xlu1 %933 }
 0x1ac   : > { %1048 = vst.msk [vmem:[%s2218_s17 + $0x48] sm:$0xff] %vm308_vm2, %v1032_v22  ;;  %v1018_v33 = vmul.f32 0.5, %v984_v23  ;;  %v954_v29 = vsub.f32 %v934_v31, %v2170_v45  ;;  %v937_v34 = vpop.xlane.xlu0 %936  ;;  %v1004_v45 = vadd.f32 %v2208_v46, %v2162_v39 }
 0x1ad   : > { %1049 = vst.msk [vmem:[%s2218_s17 + $0x50] sm:$0xff] %vm308_vm2, %v1033_v10  ;;  %v1019_v36 = vmul.f32 0.5, %v985_v26  ;;  %v955_v37 = vsub.f32 %v937_v34, %v2193_v5  ;;  %v1005_v5 = vadd.f32 %v2208_v46, %v2184_v61 }
 0x1ae   : > { %v1034_v42 = vadd.f32 %v1018_v33, %v1002_v30  ;;  %v986_v41 = vsub.f32 %v954_v29, %v970_v47 }
 0x1af   : > { %v1035_v24 = vadd.f32 %v1019_v36, %v1003_v49  ;;  %v987_v43 = vsub.f32 %v955_v37, %v971_v55  ;;  %v940_v51 = vpop.xlane.xlu1 %939 }
 0x1b0   : > { %1050 = vst.msk [vmem:[%s2218_s17 + $0x58] sm:$0xff] %vm308_vm2, %v1034_v42  ;;  %v1020_v44 = vmul.f32 0.5, %v986_v41  ;;  %v956_v54 = vsub.f32 %v940_v51, %v2188_v63 }
 0x1b1   : > { %1051 = vst.msk [vmem:[%s2218_s17 + $0x60] sm:$0xff] %vm308_vm2, %v1035_v24  ;;  %v1021_v53 = vmul.f32 0.5, %v987_v43 }
 0x1b2   : > { %v1036_v56 = vadd.f32 %v1020_v44, %v1004_v45  ;;  %v988_v52 = vsub.f32 %v956_v54, %v972_v48  ;;  %1061 = sbr.rel (!%p1863_p3) target bundleno = 490 (0x1ea), region = 48 }
 0x1b3   : > { %v1037_v57 = vadd.f32 %v1021_v53, %v1005_v5 }
 0x1b4   : > { %1052 = vst.msk [vmem:[%s2218_s17 + $0x68] sm:$0xff] %vm308_vm2, %v1036_v56  ;;  %v1022_v39 = vmul.f32 0.5, %v988_v52 }
 0x1b5   : > { %1053 = vst.msk [vmem:[%s2218_s17 + $0x70] sm:$0xff] %vm308_vm2, %v1037_v57 }
 0x1b6   : > { %v1038_v59 = vadd.f32 %v1022_v39, %v1006_v4 }
 0x1b8   : > { %1054 = vst.msk [vmem:[%s2218_s17 + $0x78] sm:$0xff] %vm308_vm2, %v1038_v59 }
 0x1b9   : > { %s2412_s5 = smov (!%p1064_p9, %s1063_s5), 16 }
 0x1ba   : > { %s1415_s11 = sshll.u32 %s2412_s5, 7 }
 0x1bb   : > { %p1418_p10 = scmp.eq.s32.totalorder %s1415_s11, 0 }
 0x1bc   : > { %s2304_s12 = sshrl.u32 (!%p1418_p10), %s2412_s5, 4 }
 0x1bd   : > { %1072 = sbr.rel (%p1418_p10) target bundleno = 490 (0x1ea), region = 52  ;;  %p1419_p11 = scmp.le.s32.totalorder (!%p1418_p10), %s2304_s12, 0 }
 0x1c4   : > { %1301 = sbr.rel (%p1419_p11) target bundleno = 469 (0x1d5), region = 134  ;;  %s2402_s19 = smov (!%p1419_p11), %s2298_s10 }
 0x1c5   : > { %s2403_s24 = smov (!%p1419_p11), %s2218_s17  ;;  %s2313_s7 = smov (!%p1419_p11), 0  }
 0x1c6   : > { %s2315_s13 = smov (!%p1419_p11), 0  }
 0x1cb LB: >> { %v1164_v58 = vld [vmem:[%s1776_s24] sm:$0xff]  ;;  %v1166_v61 = vld [vmem:[%s1776_s24 + $0x8] sm:$0xff]  ;;  %v1168_v63 = vld [vmem:[%s1776_s24 + $0x10] sm:$0xff]  ;;  %s1196_s14 = sadd.s32 1, %s1780_s7  ;;  %s1158_s13 = sadd.s32 1, %s1784_s13   ;;  %s1784_s13 = sphi %s2315_s13, %s1158_s13   ;;  %s1780_s7 = sphi %s2313_s7, %s2404_s7   ;;  %s1776_s24 = sphi %s2403_s24, %s1201_s24   ;;  %s1772_s19 = sphi %s2402_s19, %s1202_s19  }
 0x1cc   : >> { %1165 = vst [vmem:[%s1772_s19] sm:$0xff] %v1164_v58  ;;  %1167 = vst [vmem:[%s1772_s19 + $0x8] sm:$0xff] %v1166_v61  ;;  %v1170_v46 = vld [vmem:[%s1776_s24 + $0x18] sm:$0xff]  ;;  %v1172_v60 = vld [vmem:[%s1776_s24 + $0x20] sm:$0xff]  ;;  %p1197_p12 = scmp.ge.s32.totalorder %s1196_s14, %s2304_s12  ;;  %p1157_p13 = scmp.ge.s32.totalorder %s1158_s13, %s2304_s12 }
 0x1cd   : >> { %1169 = vst [vmem:[%s1772_s19 + $0x10] sm:$0xff] %v1168_v63  ;;  %v1174_v0 = vld [vmem:[%s1776_s24 + $0x28] sm:$0xff]  ;;  %1171 = vst [vmem:[%s1772_s19 + $0x18] sm:$0xff] %v1170_v46  ;;  %v1176_v3 = vld [vmem:[%s1776_s24 + $0x30] sm:$0xff] }
 0x1ce   : >> { %1173 = vst [vmem:[%s1772_s19 + $0x20] sm:$0xff] %v1172_v60  ;;  %1175 = vst [vmem:[%s1772_s19 + $0x28] sm:$0xff] %v1174_v0  ;;  %v1178_v50 = vld [vmem:[%s1776_s24 + $0x38] sm:$0xff]  ;;  %v1180_v6 = vld [vmem:[%s1776_s24 + $0x40] sm:$0xff]  ;;  %s2414_s14 = smov (%p1197_p12, %s1196_s14), 0  ;;  %1160 = sbr.rel (!%p1157_p13) target bundleno = 459 (0x1cb), region = 140 }
 0x1cf   : >> { %1177 = vst [vmem:[%s1772_s19 + $0x30] sm:$0xff] %v1176_v3  ;;  %1179 = vst [vmem:[%s1772_s19 + $0x38] sm:$0xff] %v1178_v50  ;;  %v1182_v7 = vld [vmem:[%s1776_s24 + $0x48] sm:$0xff]  ;;  %v1184_v8 = vld [vmem:[%s1776_s24 + $0x50] sm:$0xff]  ;;  %s1420_s15 = sshll.u32 %s2414_s14, 7  ;;  %s2404_s7 = smov %s2414_s14 }
 0x1d0   : >> { %1181 = vst [vmem:[%s1772_s19 + $0x40] sm:$0xff] %v1180_v6  ;;  %v1186_v2 = vld [vmem:[%s1776_s24 + $0x58] sm:$0xff]  ;;  %1183 = vst [vmem:[%s1772_s19 + $0x48] sm:$0xff] %v1182_v7  ;;  %v1188_v27 = vld [vmem:[%s1776_s24 + $0x60] sm:$0xff] }
 0x1d1   : >> { %1185 = vst [vmem:[%s1772_s19 + $0x50] sm:$0xff] %v1184_v8  ;;  %1187 = vst [vmem:[%s1772_s19 + $0x58] sm:$0xff] %v1186_v2  ;;  %v1190_v1 = vld [vmem:[%s1776_s24 + $0x68] sm:$0xff]  ;;  %v1192_v9 = vld [vmem:[%s1776_s24 + $0x70] sm:$0xff] }
 0x1d2   : >> { %1189 = vst [vmem:[%s1772_s19 + $0x60] sm:$0xff] %v1188_v27  ;;  %1191 = vst [vmem:[%s1772_s19 + $0x68] sm:$0xff] %v1190_v1  ;;  %v1194_v11 = vld [vmem:[%s1776_s24 + $0x78] sm:$0xff]  ;;  %s1201_s24 = scalar_lea.vmem %s2218_s17, %s1420_s15 [#allocation5]  }
 0x1d3   : >> { %1193 = vst [vmem:[%s1772_s19 + $0x70] sm:$0xff] %v1192_v9  ;;  %1195 = vst [vmem:[%s1772_s19 + $0x78] sm:$0xff] %v1194_v11  ;;  %s1202_s19 = scalar_lea.vmem %s2298_s10, %s1420_s15  }
 0x1d5 PF: > { %s2373_s16 = sand.u32 15, %s2412_s5   ;;  %s1431_s0 = sshll.u32 %s2304_s12, 7 }
 0x1d6   : > { %s1207_s23 = scalar_lea.vmem %s2218_s17, %s1431_s0 [#allocation5]   ;;  %s1209_s25 = scalar_lea.vmem %s2298_s10, %s1431_s0  }
 0x1d7   : > { %p1425_p0 = scmp.le.s32.totalorder %s2373_s16, 0 }
 0x1d8   : > { %s1786_s27 = smov (!%p1425_p0), %s1209_s25   ;;  %s1790_s28 = smov (!%p1425_p0), %s1207_s23  }
 0x1d9   : > { %1315 = sbr.rel (%p1425_p0) target bundleno = 490 (0x1ea), region = 145  ;;  %s1794_s29 = smov (!%p1425_p0), 0  }
 0x1da   : > { %s1798_s30 = smov (!%p1425_p0), 0  }
 0x1e0 LB: >> { %v1219_v16 = vld [vmem:[%s1792_s28] sm:$0xff]  ;;  %s1221_s5 = sadd.s32 1, %s1796_s29  ;;  %s1213_s30 = sadd.s32 1, %s1800_s30   ;;  %s1800_s30 = sphi %s1798_s30, %s1213_s30   ;;  %s1796_s29 = sphi %s1794_s29, %s1795_s29   ;;  %s1792_s28 = sphi %s1790_s28, %s1226_s28   ;;  %s1788_s27 = sphi %s1786_s27, %s1227_s27  }
 0x1e1   : >> { %1220 = vst [vmem:[%s1788_s27] sm:$0xff] %v1219_v16  ;;  %p1222_p1 = scmp.ge.s32.totalorder %s1221_s5, %s2373_s16  ;;  %p1212_p2 = scmp.ge.s32.totalorder %s1213_s30, %s2373_s16 }
 0x1e3   : >> { %s2416_s5 = smov (%p1222_p1, %s1221_s5), 0  ;;  %1215 = sbr.rel (!%p1212_p2) target bundleno = 480 (0x1e0), region = 151 }
 0x1e4   : >> { %s1426_s17 = sshll.u32 %s2416_s5, 3  ;;  %s1795_s29 = smov %s2416_s5  }
 0x1e5   : >> { %s1226_s28 = scalar_lea.vmem %s1207_s23, %s1426_s17 [#allocation5]   ;;  %s1227_s27 = scalar_lea.vmem %s1209_s25, %s1426_s17  }
 0x1ea PF: > { %s15_s21 = sadd.s32 1, %s1768_s21   ;;  %s2405_s17 = smov %s1756_s18 }
 0x1eb   : > { %p12_p3 = scmp.ge.s32.totalorder %s15_s21, 5   ;;  %s2406_s18 = smov %s1872_s26 }
 0x1ec   : > { %s2407_s19 = smov %s1764_s20  ;;  %s2408_s20 = smov %s2410_s22 }
 0x1ed   :  { %14 = sbr.rel (!%p12_p3) target bundleno = 5 (0x5), region = 162 }

</bundles_post_ra>
